<compile_context>
chip_gen: v5e
topology: v5e:2x2
jax: 0.10.0
libtpu: 0.0.40
codegen_flags: <defaults>
</compile_context>

<pallas_src>
import functools

import jax
import jax.numpy as jnp
from jax import lax
from jax.experimental import pallas as pl
from jax.experimental.pallas import tpu as pltpu

_LANE = 128  # feature dims padded to multiples of this -> lane-dense matmuls and stores


def _round_up(n, m):
    return ((n + m - 1) // m) * m


def _softplus(x):
    # PyTorch nn.Softplus(beta=1, threshold=20)
    return jnp.where(x > 20.0, x, jnp.log1p(jnp.exp(jnp.minimum(x, 20.0))))


# --------------------------------------------------------------------------------------
# Kernel
# --------------------------------------------------------------------------------------
def _decoder_kernel(H, G, P, n_genes, n_prot,
                    z_ref, lib_ref, eps_ref,
                    wh_ref, bh_ref, wz_ref, bz_ref,
                    wpx_ref, wback_ref, wfore_ref, wmix_ref,
                    gene_ref, prot_ref):
    f32 = jnp.float32
    bf16 = jnp.bfloat16
    zb = z_ref[...].astype(bf16)                                  # (TB, K) MXU operand

    # All 4 hidden branches in one matmul (eval BN folded into W/b in the wrapper) -> ReLU.
    h_all = jnp.maximum(
        jnp.dot(zb, wh_ref[...], preferred_element_type=f32) + bh_ref[...], 0.0)
    hb = h_all.astype(bf16)
    h_px = hb[:, 0 * H:1 * H]
    h_back = hb[:, 1 * H:2 * H]
    h_fore = hb[:, 2 * H:3 * H]
    h_mix = hb[:, 3 * H:4 * H]

    def z_head(lo, n):
        # z-side contribution (+ bias) of the "cat([h, z]) @ W" output linears, computed
        # just-in-time per consumer to keep peak live VMEM low.
        return (jnp.dot(zb, wz_ref[:, lo:lo + n], preferred_element_type=f32)
                + bz_ref[:, lo:lo + n])

    # ---------------- genes: softmax scale, rate ----------------
    s = jnp.dot(h_px, wpx_ref[...], preferred_element_type=f32) + z_head(0, G)
    if n_genes != G:          # keep zero-padded gene lanes out of the softmax
        gmask = lax.broadcasted_iota(jnp.int32, (1, G), 1) < n_genes
        s = jnp.where(gmask, s, -1e30)
    e = jnp.exp(s - jnp.max(s, axis=-1, keepdims=True))
    px_scale = e / jnp.sum(e, axis=-1, keepdims=True)             # exact division
    gene_ref[:, 0:G] = px_scale
    gene_ref[:, G:2 * G] = lib_ref[...] * px_scale                # px_rate = library * scale

    # ---------------- protein background ----------------
    ab = (jnp.dot(h_back, wback_ref[...], preferred_element_type=f32)
          + z_head(G, 2 * P))                                     # [alpha | beta]
    back_alpha = ab[:, 0:P]
    back_beta = _softplus(ab[:, P:2 * P]) + 1e-8
    log_back = back_alpha + back_beta * eps_ref[...]              # Normal(...).rsample()
    rate_back = jnp.exp(log_back)
    prot_ref[:, 0 * P:1 * P] = back_alpha
    prot_ref[:, 1 * P:2 * P] = back_beta
    prot_ref[:, 2 * P:3 * P] = log_back
    prot_ref[:, 3 * P:4 * P] = rate_back

    # ---------------- protein foreground ----------------
    fs = (jnp.dot(h_fore, wfore_ref[...], preferred_element_type=f32)
          + z_head(G + 2 * P, P))
    fore_scale = jnp.maximum(fs, 0.0) + (1.0 + 1e-8)              # Linear -> ReLU -> +1+eps
    rate_fore = rate_back * fore_scale
    prot_ref[:, 4 * P:5 * P] = fore_scale
    prot_ref[:, 5 * P:6 * P] = rate_fore

    # ---------------- mixing / gene dropout / protein scale ----------------
    dm = (jnp.dot(h_mix, wmix_ref[...], preferred_element_type=f32)
          + z_head(G + 3 * P, G + P))                             # [dropout | mixing]
    gene_ref[:, 2 * G:3 * G] = dm[:, 0:G]                         # px_dropout
    mixing = dm[:, G:G + P]
    prot_ref[:, 6 * P:7 * P] = mixing
    protein_mixing = 1.0 / (1.0 + jnp.exp(-mixing))               # exact sigmoid
    v = (1.0 - protein_mixing) * rate_fore                        # nonnegative -> no abs
    if n_prot != P:           # keep zero-padded protein lanes out of the L1 normalize
        pmask = lax.broadcasted_iota(jnp.int32, (1, P), 1) < n_prot
        v = jnp.where(pmask, v, 0.0)
    denom = jnp.maximum(jnp.sum(v, axis=-1, keepdims=True), 1e-12)
    prot_ref[:, 7 * P:8 * P] = v / denom                          # F.normalize(p=1)


# --------------------------------------------------------------------------------------
# One-time weight repack: fold eval BN, fuse, pad to lane multiples, cast to bf16
# --------------------------------------------------------------------------------------
def pack_params(p, compute_dtype=jnp.bfloat16):
    wh, bh, bns, bnb = p["wh"], p["bh"], p["bns"], p["bnb"]
    wgh, wgz, bg = p["wgh"], p["wgz"], p["bg"]
    wph, wpz, bp = p["wph"], p["wpz"], p["bp"]
    K, Hr = wh.shape[1], wh.shape[2]
    Gr, Pr = wgh.shape[2], wph.shape[2]
    H, G, P = _round_up(Hr, _LANE), _round_up(Gr, _LANE), _round_up(Pr, _LANE)

    # fold eval-mode BatchNorm1d into the hidden Linear
    whf = wh * bns                       # (4, K, Hr)
    bhf = bh * bns + bnb                 # (4, 1, Hr)

    def padlast(x, n):
        return jnp.pad(x, [(0, 0)] * (x.ndim - 1) + [(0, n - x.shape[-1])])

    whf = padlast(whf, H)
    bhf = padlast(bhf, H)
    wgzp = padlast(wgz, G)
    bgp = padlast(bg, G)
    wpzp = padlast(wpz, P)
    bpp = padlast(bp, P)
    wghp = jnp.pad(wgh, [(0, 0), (0, H - Hr), (0, G - Gr)])
    wphp = jnp.pad(wph, [(0, 0), (0, H - Hr), (0, P - Pr)])

    wt = lambda x: x.astype(compute_dtype)   # MXU operands bf16; biases stay f32
    # z-side head weights/biases in kernel consumption order:
    #   [gene_scale G | back_alpha P | back_beta P | fore P | gene_dropout G | mixing P]
    w_zheads = jnp.concatenate(
        [wgzp[0], wpzp[0], wpzp[1], wpzp[2], wgzp[1], wpzp[3]], axis=-1)
    b_zheads = jnp.concatenate(
        [bgp[0], bpp[0], bpp[1], bpp[2], bgp[1], bpp[3]], axis=-1)

    return {
        "w_hid": wt(jnp.concatenate([whf[0], whf[1], whf[2], whf[3]], -1)),   # (K, 4H)
        "b_hid": jnp.concatenate([bhf[0], bhf[1], bhf[2], bhf[3]], -1),       # (1, 4H) f32
        "w_zheads": wt(w_zheads),                                   # (K, 2G + 4P)
        "b_zheads": b_zheads,                                       # (1, 2G + 4P) f32
        "w_px": wt(wghp[0]),                                        # (H, G)
        "w_back": wt(jnp.concatenate([wphp[0], wphp[1]], -1)),      # (H, 2P)
        "w_fore": wt(wphp[2]),                                      # (H, P)
        "w_mix": wt(jnp.concatenate([wghp[1], wphp[3]], -1)),       # (H, G + P)
        "dims": (K, H, G, P, Hr, Gr, Pr),                           # static python ints
    }


# --------------------------------------------------------------------------------------
# Wrapper
# --------------------------------------------------------------------------------------
def decoder_totalvi(z, library_gene, eps, packed, *, tile_b=None,
                    vmem_limit_bytes=50 * 1024 * 1024):
    K, H, G, P, Hr, Gr, Pr = packed["dims"]
    f32 = jnp.float32
    B = z.shape[0]
    if tile_b is None:
        # Big batch tiles amortize the ~0.35us/grid-step overhead and fill the MXU M dim,
        # but keep >= 2 grid steps so both v7x TensorCores get work ("parallel" axis).
        # v6e (128 MiB VMEM) can profitably pass tile_b=256 explicitly.
        tile_b = min(128, max(8, _round_up(-(-B // 2), 8)))
    Bp = _round_up(B, tile_b)

    zp = jnp.pad(z.astype(f32), ((0, Bp - B), (0, 0)))
    libp = jnp.pad(library_gene.astype(f32), ((0, Bp - B), (0, 0)))
    epsp = jnp.pad(eps.astype(f32), ((0, Bp - B), (0, P - eps.shape[1])))

    grid = (Bp // tile_b,)

    def row_spec(n):
        return pl.BlockSpec((tile_b, n), lambda i: (i, 0))

    def const_spec(shape):
        # Weights: constant index_map -> DMA'd once, VMEM-resident across the whole grid.
        return pl.BlockSpec(shape, lambda i: (0, 0))

    Wz = 2 * G + 4 * P
    in_specs = [
        row_spec(K), row_spec(1), row_spec(P),
        const_spec((K, 4 * H)), const_spec((1, 4 * H)),
        const_spec((K, Wz)), const_spec((1, Wz)),
        const_spec((H, G)), const_spec((H, 2 * P)),
        const_spec((H, P)), const_spec((H, G + P)),
    ]
    out_specs = (pl.BlockSpec((tile_b, 3 * G), lambda i: (i, 0)),
                 pl.BlockSpec((tile_b, 8 * P), lambda i: (i, 0)))
    out_shape = (jax.ShapeDtypeStruct((Bp, 3 * G), f32),
                 jax.ShapeDtypeStruct((Bp, 8 * P), f32))

    # Advisory cost estimate (mem-bound kernel; helps XLA overlap its neighbours).
    flops = 2 * Bp * (K * (4 * H + Wz) + H * (2 * G + 4 * P))
    weight_bytes = sum(int(packed[k].size) * packed[k].dtype.itemsize
                       for k in ("w_hid", "b_hid", "w_zheads", "b_zheads",
                                 "w_px", "w_back", "w_fore", "w_mix"))
    bytes_accessed = Bp * (K + 1 + P) * 4 + weight_bytes + Bp * (3 * G + 8 * P) * 4
    cost = pl.CostEstimate(flops=flops, transcendentals=Bp * (G + 4 * P),
                           bytes_accessed=bytes_accessed)

    kernel = functools.partial(_decoder_kernel, H, G, P, Gr, Pr)

    gene, prot = pl.pallas_call(
        kernel,
        grid=grid,
        in_specs=in_specs,
        out_specs=out_specs,
        out_shape=out_shape,
        compiler_params=pltpu.CompilerParams(
            dimension_semantics=("parallel",),
            vmem_limit_bytes=vmem_limit_bytes),
        cost_estimate=cost,
    )(zp, libp, epsp,
      packed["w_hid"], packed["b_hid"], packed["w_zheads"], packed["b_zheads"],
      packed["w_px"], packed["w_back"], packed["w_fore"], packed["w_mix"])

    gs = lambda k: gene[:B, k * G:k * G + Gr]
    ps = lambda k: prot[:B, k * P:k * P + Pr]
    px_ = {"scale": gs(0), "rate": gs(1), "dropout": gs(2)}
    py_ = {"back_alpha": ps(0), "back_beta": ps(1), "rate_back": ps(3),
           "fore_scale": ps(4), "rate_fore": ps(5), "mixing": ps(6), "scale": ps(7)}
    return px_, py_, ps(2)


# --------------------------------------------------------------------------------------
# References (for the built-in correctness check)
# --------------------------------------------------------------------------------------
def decoder_totalvi_ref_packed(z, library_gene, eps, packed):
    """Plain-JAX mirror of the kernel math (same bf16 MXU operands, f32 accumulation)."""
    K, H, G, P, Hr, Gr, Pr = packed["dims"]
    f32 = jnp.float32
    cdt = packed["w_hid"].dtype
    zb = z.astype(cdt)
    dot = lambda a, b: jnp.dot(a, b, preferred_element_type=f32)

    h_all = jnp.maximum(dot(zb, packed["w_hid"]) + packed["b_hid"], 0.0)
    hb = h_all.astype(cdt)
    h_px, h_back = hb[:, 0:H], hb[:, H:2 * H]
    h_fore, h_mix = hb[:, 2 * H:3 * H], hb[:, 3 * H:4 * H]
    wz, bz = packed["w_zheads"], packed["b_zheads"]
    z_head = lambda lo, n: dot(zb, wz[:, lo:lo + n]) + bz[:, lo:lo + n]

    s = (dot(h_px, packed["w_px"]) + z_head(0, G))[:, :Gr]
    px_scale = jax.nn.softmax(s, axis=-1)
    px_rate = library_gene * px_scale
    ab = dot(h_back, packed["w_back"]) + z_head(G, 2 * P)
    back_alpha = ab[:, 0:Pr]
    back_beta = _softplus(ab[:, P:P + Pr]) + 1e-8
    log_back = back_alpha + back_beta * eps
    rate_back = jnp.exp(log_back)
    fs = (dot(h_fore, packed["w_fore"]) + z_head(G + 2 * P, P))[:, :Pr]
    fore_scale = jnp.maximum(fs, 0.0) + (1.0 + 1e-8)
    rate_fore = rate_back * fore_scale
    dm = dot(h_mix, packed["w_mix"]) + z_head(G + 3 * P, G + P)
    px_dropout = dm[:, 0:Gr]
    mixing = dm[:, G:G + Pr]
    pmix = jax.nn.sigmoid(mixing)
    v = (1.0 - pmix) * rate_fore
    py_scale = v / jnp.maximum(jnp.sum(v, axis=-1, keepdims=True), 1e-12)
    return (px_scale, px_rate, px_dropout, back_alpha, back_beta, log_back,
            rate_back, fore_scale, rate_fore, mixing, py_scale)


def decoder_totalvi_ref(z, library_gene, eps, p):
    """Full-f32 reference following the torch module structure (raw, unfolded params)."""
    def hidden(i):
        h = z @ p["wh"][i] + p["bh"][i]
        h = h * p["bns"][i] + p["bnb"][i]
        return jnp.maximum(h, 0.0)

    def lin_g(i, h):
        return h @ p["wgh"][i] + z @ p["wgz"][i] + p["bg"][i]

    def lin_p(i, h):
        return h @ p["wph"][i] + z @ p["wpz"][i] + p["bp"][i]

    px = hidden(0)
    px_scale = jax.nn.softmax(lin_g(0, px), axis=-1)
    px_rate = library_gene * px_scale
    pb = hidden(1)
    back_alpha = lin_p(0, pb)
    back_beta = jax.nn.softplus(lin_p(1, pb)) + 1e-8
    log_back = back_alpha + back_beta * eps
    rate_back = jnp.exp(log_back)
    pf = hidden(2)
    fore_scale = jnp.maximum(lin_p(2, pf), 0.0) + 1.0 + 1e-8
    rate_fore = rate_back * fore_scale
    pm = hidden(3)
    px_dropout = lin_g(1, pm)
    mixing = lin_p(3, pm)
    pmix = jax.nn.sigmoid(mixing)
    v = (1.0 - pmix) * rate_fore
    py_scale = v / jnp.maximum(jnp.sum(jnp.abs(v), axis=-1, keepdims=True), 1e-12)
    return (px_scale, px_rate, px_dropout, back_alpha, back_beta, log_back,
            rate_back, fore_scale, rate_fore, mixing, py_scale)


def make_params(key, n_input, n_hidden, n_genes, n_proteins):
    ks = jax.random.split(key, 12)
    f32 = jnp.float32
    # 4 hidden decoders: px, py_back, py_fore, sigmoid
    wh = 0.2 * jax.random.normal(ks[0], (4, n_input, n_hidden), f32)
    bh = 0.05 * jax.random.normal(ks[1], (4, 1, n_hidden), f32)
    # BatchNorm1d(n_hidden, eps=1e-3) eval-mode parameters, folded to scale/shift
    gamma = 1.0 + 0.1 * jax.random.normal(ks[2], (4, 1, n_hidden), f32)
    beta = 0.05 * jax.random.normal(ks[3], (4, 1, n_hidden), f32)
    running_mean = 0.1 * jax.random.normal(ks[4], (4, 1, n_hidden), f32)
    running_var = jnp.abs(1.0 + 0.1 * jax.random.normal(ks[5], (4, 1, n_hidden), f32))
    bns = gamma / jnp.sqrt(running_var + 1e-3)
    bnb = beta - running_mean * bns
    # gene-output linears (px_scale_decoder, px_dropout_decoder_gene), weight split h/z
    wgh = 0.2 * jax.random.normal(ks[6], (2, n_hidden, n_genes), f32)
    wgz = 0.2 * jax.random.normal(ks[7], (2, n_input, n_genes), f32)
    bg = 0.05 * jax.random.normal(ks[8], (2, 1, n_genes), f32)
    # protein-output linears (back_alpha, back_beta, fore_scale, background/mixing)
    wph = 0.2 * jax.random.normal(ks[9], (4, n_hidden, n_proteins), f32)
    wpz = 0.2 * jax.random.normal(ks[10], (4, n_input, n_proteins), f32)
    bp = 0.05 * jax.random.normal(ks[11], (4, 1, n_proteins), f32)
    return {"wh": wh, "bh": bh, "bns": bns, "bnb": bnb,
            "wgh": wgh, "wgz": wgz, "bg": bg,
            "wph": wph, "wpz": wpz, "bp": bp}


if __name__ == "__main__":
    B, n_input, n_hidden = 16, 16, 32
    n_genes, n_proteins = 48, 24

    key = jax.random.PRNGKey(0)
    kz, klib, keps, kp = jax.random.split(key, 4)
    z = jax.random.normal(kz, (B, n_input), jnp.float32)
    library_gene = jnp.abs(jax.random.normal(klib, (B, 1), jnp.float32)) * 100.0 + 1.0
    eps = jax.random.normal(keps, (B, n_proteins), jnp.float32)   # Normal.rsample noise
    params = make_params(kp, n_input, n_hidden, n_genes, n_proteins)
    packed = pack_params(params)        # one-time: fold BN, fuse, pad, cast weights to bf16

    px_, py_, log_pro_back_mean = decoder_totalvi(z, library_gene, eps, packed)
    jax.block_until_ready((px_, py_, log_pro_back_mean))

    got = (px_["scale"], px_["rate"], px_["dropout"],
           py_["back_alpha"], py_["back_beta"], log_pro_back_mean,
           py_["rate_back"], py_["fore_scale"], py_["rate_fore"],
           py_["mixing"], py_["scale"])

    # Tight check vs a plain-JAX mirror using the same bf16 MXU operands (exercises the
    # Pallas tiling / padding / packing mechanics without dtype-quantization slack).
    ref_q = decoder_totalvi_ref_packed(z, library_gene, eps, packed)
    for g, r in zip(got, ref_q):
        assert g.shape == r.shape and g.dtype == r.dtype, (g.shape, r.shape, g.dtype, r.dtype)
        assert jnp.allclose(g, r, rtol=2e-3, atol=2e-3), float(jnp.max(jnp.abs(g - r)))

    # Loose check vs the full-f32 torch-structured reference (validates BN folding and the
    # fused weight packing); tolerance sized for bf16 weight/activation quantization.
    ref_f = decoder_totalvi_ref(z, library_gene, eps, params)
    for g, r in zip(got, ref_f):
        assert jnp.allclose(g, r, rtol=1.5e-1, atol=1.5e-1), float(jnp.max(jnp.abs(g - r)))

    print("KERNEL_OK")
</pallas_src>

<mosaic_0001>
module attributes {stable_mosaic.version = 11 : i64} {
  func.func @_decoder_kernel(%arg0: i32, %arg1: memref<8x16xf32, #tpu.memory_space<vmem>>, %arg2: memref<8x1xf32, #tpu.memory_space<vmem>>, %arg3: memref<8x128xf32, #tpu.memory_space<vmem>>, %arg4: memref<16x512xbf16, #tpu.memory_space<vmem>>, %arg5: memref<1x512xf32, #tpu.memory_space<vmem>>, %arg6: memref<16x768xbf16, #tpu.memory_space<vmem>>, %arg7: memref<1x768xf32, #tpu.memory_space<vmem>>, %arg8: memref<128x128xbf16, #tpu.memory_space<vmem>>, %arg9: memref<128x256xbf16, #tpu.memory_space<vmem>>, %arg10: memref<128x128xbf16, #tpu.memory_space<vmem>>, %arg11: memref<128x256xbf16, #tpu.memory_space<vmem>>, %arg12: memref<8x384xf32, #tpu.memory_space<vmem>>, %arg13: memref<8x1024xf32, #tpu.memory_space<vmem>>) attributes {dimension_semantics = [#tpu.dimension_semantics<parallel>], iteration_bounds = array<i64: 2>, scalar_prefetch = 0 : i64, scratch_operands = 0 : i64, tpu.core_type = #tpu.core_type<tc>, window_params = [{transform_indices = @transform_0, window_bounds = array<i64: 8, 16>}, {transform_indices = @transform_1, window_bounds = array<i64: 8, 1>}, {transform_indices = @transform_2, window_bounds = array<i64: 8, 128>}, {pipeline_mode = #tpu.pipeline_mode<synchronous>, transform_indices = @transform_3, window_bounds = array<i64: 16, 512>}, {pipeline_mode = #tpu.pipeline_mode<synchronous>, transform_indices = @transform_4, window_bounds = array<i64: 1, 512>}, {pipeline_mode = #tpu.pipeline_mode<synchronous>, transform_indices = @transform_5, window_bounds = array<i64: 16, 768>}, {pipeline_mode = #tpu.pipeline_mode<synchronous>, transform_indices = @transform_6, window_bounds = array<i64: 1, 768>}, {pipeline_mode = #tpu.pipeline_mode<synchronous>, transform_indices = @transform_7, window_bounds = array<i64: 128, 128>}, {pipeline_mode = #tpu.pipeline_mode<synchronous>, transform_indices = @transform_8, window_bounds = array<i64: 128, 256>}, {pipeline_mode = #tpu.pipeline_mode<synchronous>, transform_indices = @transform_9, window_bounds = array<i64: 128, 128>}, {pipeline_mode = #tpu.pipeline_mode<synchronous>, transform_indices = @transform_10, window_bounds = array<i64: 128, 256>}, {transform_indices = @transform_11, window_bounds = array<i64: 8, 384>}, {transform_indices = @transform_12, window_bounds = array<i64: 8, 1024>}]} {
    %c0 = arith.constant 0 : index
    %c0_0 = arith.constant 0 : index
    %0 = vector.load %arg1[%c0, %c0_0] : memref<8x16xf32, #tpu.memory_space<vmem>>, vector<8x16xf32>
    %1 = arith.truncf %0 : vector<8x16xf32> to vector<8x16xbf16>
    %c0_1 = arith.constant 0 : index
    %c0_2 = arith.constant 0 : index
    %2 = vector.load %arg4[%c0_1, %c0_2] : memref<16x512xbf16, #tpu.memory_space<vmem>>, vector<16x512xbf16>
    %cst = arith.constant dense<0.000000e+00> : vector<8x512xf32>
    %3 = tpu.matmul %1, %2, %cst {dimension_numbers = #tpu.dot_dimension_numbers<[1], [0], [0], [1], [0, 0, 1, 1], [], []>} : vector<8x16xbf16>, vector<16x512xbf16>, vector<8x512xf32> -> vector<8x512xf32>
    %c0_3 = arith.constant 0 : index
    %c0_4 = arith.constant 0 : index
    %4 = vector.load %arg5[%c0_3, %c0_4] : memref<1x512xf32, #tpu.memory_space<vmem>>, vector<1x512xf32>
    %5 = vector.broadcast %4 : vector<1x512xf32> to vector<8x512xf32>
    %6 = arith.addf %3, %5 : vector<8x512xf32>
    %cst_5 = arith.constant 0.000000e+00 : f32
    %7 = vector.broadcast %cst_5 : f32 to vector<8x512xf32>
    %8 = arith.maximumf %6, %7 : vector<8x512xf32>
    %9 = arith.truncf %8 : vector<8x512xf32> to vector<8x512xbf16>
    %10 = vector.extract_strided_slice %9 {offsets = [0, 0], sizes = [8, 128], strides = [1, 1]} : vector<8x512xbf16> to vector<8x128xbf16>
    %11 = vector.extract_strided_slice %9 {offsets = [0, 128], sizes = [8, 128], strides = [1, 1]} : vector<8x512xbf16> to vector<8x128xbf16>
    %12 = vector.extract_strided_slice %9 {offsets = [0, 256], sizes = [8, 128], strides = [1, 1]} : vector<8x512xbf16> to vector<8x128xbf16>
    %13 = vector.extract_strided_slice %9 {offsets = [0, 384], sizes = [8, 128], strides = [1, 1]} : vector<8x512xbf16> to vector<8x128xbf16>
    %c0_6 = arith.constant 0 : index
    %c0_7 = arith.constant 0 : index
    %14 = vector.load %arg8[%c0_6, %c0_7] : memref<128x128xbf16, #tpu.memory_space<vmem>>, vector<128x128xbf16>
    %cst_8 = arith.constant dense<0.000000e+00> : vector<8x128xf32>
    %15 = tpu.matmul %10, %14, %cst_8 {dimension_numbers = #tpu.dot_dimension_numbers<[1], [0], [0], [1], [0, 0, 1, 1], [], []>} : vector<8x128xbf16>, vector<128x128xbf16>, vector<8x128xf32> -> vector<8x128xf32>
    %c0_9 = arith.constant 0 : index
    %c0_10 = arith.constant 0 : index
    %16 = vector.load %arg6[%c0_9, %c0_10] : memref<16x768xbf16, #tpu.memory_space<vmem>>, vector<16x128xbf16>
    %cst_11 = arith.constant dense<0.000000e+00> : vector<8x128xf32>
    %17 = tpu.matmul %1, %16, %cst_11 {dimension_numbers = #tpu.dot_dimension_numbers<[1], [0], [0], [1], [0, 0, 1, 1], [], []>} : vector<8x16xbf16>, vector<16x128xbf16>, vector<8x128xf32> -> vector<8x128xf32>
    %c0_12 = arith.constant 0 : index
    %c0_13 = arith.constant 0 : index
    %18 = vector.load %arg7[%c0_12, %c0_13] : memref<1x768xf32, #tpu.memory_space<vmem>>, vector<1x128xf32>
    %19 = vector.broadcast %18 : vector<1x128xf32> to vector<8x128xf32>
    %20 = arith.addf %17, %19 : vector<8x128xf32>
    %21 = arith.addf %15, %20 : vector<8x128xf32>
    %22 = tpu.iota {dimensions = array<i32: 1>} : vector<1x128xi32>
    %c48_i32 = arith.constant 48 : i32
    %23 = vector.broadcast %c48_i32 : i32 to vector<1x128xi32>
    %24 = arith.cmpi slt, %22, %23 : vector<1x128xi32>
    %cst_14 = arith.constant -1.000000e+30 : f32
    %25 = vector.shape_cast %24 : vector<1x128xi1> to vector<1x128xi1>
    %26 = vector.broadcast %25 : vector<1x128xi1> to vector<8x128xi1>
    %27 = vector.broadcast %cst_14 : f32 to vector<8x128xf32>
    %28 = arith.select %26, %21, %27 : vector<8x128xi1>, vector<8x128xf32>
    %cst_15 = arith.constant dense<0xFF800000> : vector<8xf32>
    %29 = vector.multi_reduction <maximumf>, %28, %cst_15 [1] : vector<8x128xf32> to vector<8xf32>
    %30 = vector.shape_cast %29 : vector<8xf32> to vector<8x1xf32>
    %31 = vector.broadcast %30 : vector<8x1xf32> to vector<8x128xf32>
    %32 = arith.subf %28, %31 : vector<8x128xf32>
    %33 = math.exp %32 : vector<8x128xf32>
    %cst_16 = arith.constant dense<0.000000e+00> : vector<8xf32>
    %34 = vector.multi_reduction <add>, %33, %cst_16 [1] : vector<8x128xf32> to vector<8xf32>
    %35 = vector.shape_cast %34 : vector<8xf32> to vector<8x1xf32>
    %36 = vector.broadcast %35 : vector<8x1xf32> to vector<8x128xf32>
    %37 = arith.divf %33, %36 : vector<8x128xf32>
    %c0_17 = arith.constant 0 : index
    %c0_18 = arith.constant 0 : index
    %38 = vector.load %arg12[%c0_17, %c0_18] : memref<8x384xf32, #tpu.memory_space<vmem>>, vector<8x128xf32>
    tpu.vector_store %arg12[%c0_17, %c0_18], %37 {strides = array<i32>} : memref<8x384xf32, #tpu.memory_space<vmem>>, vector<8x128xf32>,
    %c0_19 = arith.constant 0 : index
    %c0_20 = arith.constant 0 : index
    %39 = vector.load %arg2[%c0_19, %c0_20] : memref<8x1xf32, #tpu.memory_space<vmem>>, vector<8x1xf32>
    %40 = vector.broadcast %39 : vector<8x1xf32> to vector<8x128xf32>
    %41 = arith.mulf %40, %37 : vector<8x128xf32>
    %c0_21 = arith.constant 0 : index
    %c128 = arith.constant 128 : index
    %42 = vector.load %arg12[%c0_21, %c128] : memref<8x384xf32, #tpu.memory_space<vmem>>, vector<8x128xf32>
    tpu.vector_store %arg12[%c0_21, %c128], %41 {strides = array<i32>} : memref<8x384xf32, #tpu.memory_space<vmem>>, vector<8x128xf32>,
    %c0_22 = arith.constant 0 : index
    %c0_23 = arith.constant 0 : index
    %43 = vector.load %arg9[%c0_22, %c0_23] : memref<128x256xbf16, #tpu.memory_space<vmem>>, vector<128x256xbf16>
    %cst_24 = arith.constant dense<0.000000e+00> : vector<8x256xf32>
    %44 = tpu.matmul %11, %43, %cst_24 {dimension_numbers = #tpu.dot_dimension_numbers<[1], [0], [0], [1], [0, 0, 1, 1], [], []>} : vector<8x128xbf16>, vector<128x256xbf16>, vector<8x256xf32> -> vector<8x256xf32>
    %c0_25 = arith.constant 0 : index
    %c128_26 = arith.constant 128 : index
    %45 = vector.load %arg6[%c0_25, %c128_26] : memref<16x768xbf16, #tpu.memory_space<vmem>>, vector<16x256xbf16>
    %cst_27 = arith.constant dense<0.000000e+00> : vector<8x256xf32>
    %46 = tpu.matmul %1, %45, %cst_27 {dimension_numbers = #tpu.dot_dimension_numbers<[1], [0], [0], [1], [0, 0, 1, 1], [], []>} : vector<8x16xbf16>, vector<16x256xbf16>, vector<8x256xf32> -> vector<8x256xf32>
    %c0_28 = arith.constant 0 : index
    %c128_29 = arith.constant 128 : index
    %47 = vector.load %arg7[%c0_28, %c128_29] : memref<1x768xf32, #tpu.memory_space<vmem>>, vector<1x256xf32>
    %48 = vector.broadcast %47 : vector<1x256xf32> to vector<8x256xf32>
    %49 = arith.addf %46, %48 : vector<8x256xf32>
    %50 = arith.addf %44, %49 : vector<8x256xf32>
    %51 = vector.extract_strided_slice %50 {offsets = [0, 0], sizes = [8, 128], strides = [1, 1]} : vector<8x256xf32> to vector<8x128xf32>
    %52 = vector.extract_strided_slice %50 {offsets = [0, 128], sizes = [8, 128], strides = [1, 1]} : vector<8x256xf32> to vector<8x128xf32>
    %cst_30 = arith.constant 2.000000e+01 : f32
    %53 = vector.broadcast %cst_30 : f32 to vector<8x128xf32>
    %54 = arith.cmpf ogt, %52, %53 : vector<8x128xf32>
    %cst_31 = arith.constant 2.000000e+01 : f32
    %55 = vector.broadcast %cst_31 : f32 to vector<8x128xf32>
    %56 = arith.minimumf %52, %55 : vector<8x128xf32>
    %57 = math.exp %56 : vector<8x128xf32>
    %58 = math.log1p %57 : vector<8x128xf32>
    %59 = arith.select %54, %52, %58 : vector<8x128xi1>, vector<8x128xf32>
    %cst_32 = arith.constant 9.99999993E-9 : f32
    %60 = vector.broadcast %cst_32 : f32 to vector<8x128xf32>
    %61 = arith.addf %59, %60 : vector<8x128xf32>
    %c0_33 = arith.constant 0 : index
    %c0_34 = arith.constant 0 : index
    %62 = vector.load %arg3[%c0_33, %c0_34] : memref<8x128xf32, #tpu.memory_space<vmem>>, vector<8x128xf32>
    %63 = arith.mulf %61, %62 : vector<8x128xf32>
    %64 = arith.addf %51, %63 : vector<8x128xf32>
    %65 = math.exp %64 : vector<8x128xf32>
    %c0_35 = arith.constant 0 : index
    %c0_36 = arith.constant 0 : index
    %66 = vector.load %arg13[%c0_35, %c0_36] : memref<8x1024xf32, #tpu.memory_space<vmem>>, vector<8x128xf32>
    tpu.vector_store %arg13[%c0_35, %c0_36], %51 {strides = array<i32>} : memref<8x1024xf32, #tpu.memory_space<vmem>>, vector<8x128xf32>,
    %c0_37 = arith.constant 0 : index
    %c128_38 = arith.constant 128 : index
    %67 = vector.load %arg13[%c0_37, %c128_38] : memref<8x1024xf32, #tpu.memory_space<vmem>>, vector<8x128xf32>
    tpu.vector_store %arg13[%c0_37, %c128_38], %61 {strides = array<i32>} : memref<8x1024xf32, #tpu.memory_space<vmem>>, vector<8x128xf32>,
    %c0_39 = arith.constant 0 : index
    %c256 = arith.constant 256 : index
    %68 = vector.load %arg13[%c0_39, %c256] : memref<8x1024xf32, #tpu.memory_space<vmem>>, vector<8x128xf32>
    tpu.vector_store %arg13[%c0_39, %c256], %64 {strides = array<i32>} : memref<8x1024xf32, #tpu.memory_space<vmem>>, vector<8x128xf32>,
    %c0_40 = arith.constant 0 : index
    %c384 = arith.constant 384 : index
    %69 = vector.load %arg13[%c0_40, %c384] : memref<8x1024xf32, #tpu.memory_space<vmem>>, vector<8x128xf32>
    tpu.vector_store %arg13[%c0_40, %c384], %65 {strides = array<i32>} : memref<8x1024xf32, #tpu.memory_space<vmem>>, vector<8x128xf32>,
    %c0_41 = arith.constant 0 : index
    %c0_42 = arith.constant 0 : index
    %70 = vector.load %arg10[%c0_41, %c0_42] : memref<128x128xbf16, #tpu.memory_space<vmem>>, vector<128x128xbf16>
    %cst_43 = arith.constant dense<0.000000e+00> : vector<8x128xf32>
    %71 = tpu.matmul %12, %70, %cst_43 {dimension_numbers = #tpu.dot_dimension_numbers<[1], [0], [0], [1], [0, 0, 1, 1], [], []>} : vector<8x128xbf16>, vector<128x128xbf16>, vector<8x128xf32> -> vector<8x128xf32>
    %c0_44 = arith.constant 0 : index
    %c384_45 = arith.constant 384 : index
    %72 = vector.load %arg6[%c0_44, %c384_45] : memref<16x768xbf16, #tpu.memory_space<vmem>>, vector<16x128xbf16>
    %cst_46 = arith.constant dense<0.000000e+00> : vector<8x128xf32>
    %73 = tpu.matmul %1, %72, %cst_46 {dimension_numbers = #tpu.dot_dimension_numbers<[1], [0], [0], [1], [0, 0, 1, 1], [], []>} : vector<8x16xbf16>, vector<16x128xbf16>, vector<8x128xf32> -> vector<8x128xf32>
    %c0_47 = arith.constant 0 : index
    %c384_48 = arith.constant 384 : index
    %74 = vector.load %arg7[%c0_47, %c384_48] : memref<1x768xf32, #tpu.memory_space<vmem>>, vector<1x128xf32>
    %75 = vector.broadcast %74 : vector<1x128xf32> to vector<8x128xf32>
    %76 = arith.addf %73, %75 : vector<8x128xf32>
    %77 = arith.addf %71, %76 : vector<8x128xf32>
    %cst_49 = arith.constant 0.000000e+00 : f32
    %78 = vector.broadcast %cst_49 : f32 to vector<8x128xf32>
    %79 = arith.maximumf %77, %78 : vector<8x128xf32>
    %cst_50 = arith.constant 1.000000e+00 : f32
    %80 = vector.broadcast %cst_50 : f32 to vector<8x128xf32>
    %81 = arith.addf %79, %80 : vector<8x128xf32>
    %82 = arith.mulf %65, %81 : vector<8x128xf32>
    %c0_51 = arith.constant 0 : index
    %c512 = arith.constant 512 : index
    %83 = vector.load %arg13[%c0_51, %c512] : memref<8x1024xf32, #tpu.memory_space<vmem>>, vector<8x128xf32>
    tpu.vector_store %arg13[%c0_51, %c512], %81 {strides = array<i32>} : memref<8x1024xf32, #tpu.memory_space<vmem>>, vector<8x128xf32>,
    %c0_52 = arith.constant 0 : index
    %c640 = arith.constant 640 : index
    %84 = vector.load %arg13[%c0_52, %c640] : memref<8x1024xf32, #tpu.memory_space<vmem>>, vector<8x128xf32>
    tpu.vector_store %arg13[%c0_52, %c640], %82 {strides = array<i32>} : memref<8x1024xf32, #tpu.memory_space<vmem>>, vector<8x128xf32>,
    %c0_53 = arith.constant 0 : index
    %c0_54 = arith.constant 0 : index
    %85 = vector.load %arg11[%c0_53, %c0_54] : memref<128x256xbf16, #tpu.memory_space<vmem>>, vector<128x256xbf16>
    %cst_55 = arith.constant dense<0.000000e+00> : vector<8x256xf32>
    %86 = tpu.matmul %13, %85, %cst_55 {dimension_numbers = #tpu.dot_dimension_numbers<[1], [0], [0], [1], [0, 0, 1, 1], [], []>} : vector<8x128xbf16>, vector<128x256xbf16>, vector<8x256xf32> -> vector<8x256xf32>
    %c0_56 = arith.constant 0 : index
    %c512_57 = arith.constant 512 : index
    %87 = vector.load %arg6[%c0_56, %c512_57] : memref<16x768xbf16, #tpu.memory_space<vmem>>, vector<16x256xbf16>
    %cst_58 = arith.constant dense<0.000000e+00> : vector<8x256xf32>
    %88 = tpu.matmul %1, %87, %cst_58 {dimension_numbers = #tpu.dot_dimension_numbers<[1], [0], [0], [1], [0, 0, 1, 1], [], []>} : vector<8x16xbf16>, vector<16x256xbf16>, vector<8x256xf32> -> vector<8x256xf32>
    %c0_59 = arith.constant 0 : index
    %c512_60 = arith.constant 512 : index
    %89 = vector.load %arg7[%c0_59, %c512_60] : memref<1x768xf32, #tpu.memory_space<vmem>>, vector<1x256xf32>
    %90 = vector.broadcast %89 : vector<1x256xf32> to vector<8x256xf32>
    %91 = arith.addf %88, %90 : vector<8x256xf32>
    %92 = arith.addf %86, %91 : vector<8x256xf32>
    %93 = vector.extract_strided_slice %92 {offsets = [0, 0], sizes = [8, 128], strides = [1, 1]} : vector<8x256xf32> to vector<8x128xf32>
    %c0_61 = arith.constant 0 : index
    %c256_62 = arith.constant 256 : index
    %94 = vector.load %arg12[%c0_61, %c256_62] : memref<8x384xf32, #tpu.memory_space<vmem>>, vector<8x128xf32>
    tpu.vector_store %arg12[%c0_61, %c256_62], %93 {strides = array<i32>} : memref<8x384xf32, #tpu.memory_space<vmem>>, vector<8x128xf32>,
    %95 = vector.extract_strided_slice %92 {offsets = [0, 128], sizes = [8, 128], strides = [1, 1]} : vector<8x256xf32> to vector<8x128xf32>
    %c0_63 = arith.constant 0 : index
    %c768 = arith.constant 768 : index
    %96 = vector.load %arg13[%c0_63, %c768] : memref<8x1024xf32, #tpu.memory_space<vmem>>, vector<8x128xf32>
    tpu.vector_store %arg13[%c0_63, %c768], %95 {strides = array<i32>} : memref<8x1024xf32, #tpu.memory_space<vmem>>, vector<8x128xf32>,
    %cst_64 = arith.constant 0.000000e+00 : f32
    %97 = vector.broadcast %cst_64 : f32 to vector<8x128xf32>
    %98 = arith.subf %97, %95 : vector<8x128xf32>
    %99 = math.exp %98 : vector<8x128xf32>
    %cst_65 = arith.constant 1.000000e+00 : f32
    %100 = vector.broadcast %cst_65 : f32 to vector<8x128xf32>
    %101 = arith.addf %100, %99 : vector<8x128xf32>
    %cst_66 = arith.constant 1.000000e+00 : f32
    %102 = vector.broadcast %cst_66 : f32 to vector<8x128xf32>
    %103 = arith.divf %102, %101 : vector<8x128xf32>
    %cst_67 = arith.constant 1.000000e+00 : f32
    %104 = vector.broadcast %cst_67 : f32 to vector<8x128xf32>
    %105 = arith.subf %104, %103 : vector<8x128xf32>
    %106 = arith.mulf %105, %82 : vector<8x128xf32>
    %107 = tpu.iota {dimensions = array<i32: 1>} : vector<1x128xi32>
    %c24_i32 = arith.constant 24 : i32
    %108 = vector.broadcast %c24_i32 : i32 to vector<1x128xi32>
    %109 = arith.cmpi slt, %107, %108 : vector<1x128xi32>
    %cst_68 = arith.constant 0.000000e+00 : f32
    %110 = vector.shape_cast %109 : vector<1x128xi1> to vector<1x128xi1>
    %111 = vector.broadcast %110 : vector<1x128xi1> to vector<8x128xi1>
    %112 = vector.broadcast %cst_68 : f32 to vector<8x128xf32>
    %113 = arith.select %111, %106, %112 : vector<8x128xi1>, vector<8x128xf32>
    %cst_69 = arith.constant dense<0.000000e+00> : vector<8xf32>
    %114 = vector.multi_reduction <add>, %113, %cst_69 [1] : vector<8x128xf32> to vector<8xf32>
    %115 = vector.shape_cast %114 : vector<8xf32> to vector<8x1xf32>
    %cst_70 = arith.constant 9.99999996E-13 : f32
    %116 = vector.broadcast %cst_70 : f32 to vector<8x1xf32>
    %117 = arith.maximumf %115, %116 : vector<8x1xf32>
    %118 = vector.broadcast %117 : vector<8x1xf32> to vector<8x128xf32>
    %119 = arith.divf %113, %118 : vector<8x128xf32>
    %c0_71 = arith.constant 0 : index
    %c896 = arith.constant 896 : index
    %120 = vector.load %arg13[%c0_71, %c896] : memref<8x1024xf32, #tpu.memory_space<vmem>>, vector<8x128xf32>
    tpu.vector_store %arg13[%c0_71, %c896], %119 {strides = array<i32>} : memref<8x1024xf32, #tpu.memory_space<vmem>>, vector<8x128xf32>,
    return
  }
  func.func @transform_0(%arg0: i32) -> (i32, i32) {
    %c0_i32 = arith.constant 0 : i32
    %c0_i32_0 = arith.constant 0 : i32
    return %arg0, %c0_i32 : i32, i32
  }
  func.func @transform_1(%arg0: i32) -> (i32, i32) {
    %c0_i32 = arith.constant 0 : i32
    %c0_i32_0 = arith.constant 0 : i32
    return %arg0, %c0_i32 : i32, i32
  }
  func.func @transform_2(%arg0: i32) -> (i32, i32) {
    %c0_i32 = arith.constant 0 : i32
    %c0_i32_0 = arith.constant 0 : i32
    return %arg0, %c0_i32 : i32, i32
  }
  func.func @transform_3(%arg0: i32) -> (i32, i32) {
    %c0_i32 = arith.constant 0 : i32
    %c0_i32_0 = arith.constant 0 : i32
    %c0_i32_1 = arith.constant 0 : i32
    return %c0_i32, %c0_i32_0 : i32, i32
  }
  func.func @transform_4(%arg0: i32) -> (i32, i32) {
    %c0_i32 = arith.constant 0 : i32
    %c0_i32_0 = arith.constant 0 : i32
    %c0_i32_1 = arith.constant 0 : i32
    return %c0_i32, %c0_i32_0 : i32, i32
  }
  func.func @transform_5(%arg0: i32) -> (i32, i32) {
    %c0_i32 = arith.constant 0 : i32
    %c0_i32_0 = arith.constant 0 : i32
    %c0_i32_1 = arith.constant 0 : i32
    return %c0_i32, %c0_i32_0 : i32, i32
  }
  func.func @transform_6(%arg0: i32) -> (i32, i32) {
    %c0_i32 = arith.constant 0 : i32
    %c0_i32_0 = arith.constant 0 : i32
    %c0_i32_1 = arith.constant 0 : i32
    return %c0_i32, %c0_i32_0 : i32, i32
  }
  func.func @transform_7(%arg0: i32) -> (i32, i32) {
    %c0_i32 = arith.constant 0 : i32
    %c0_i32_0 = arith.constant 0 : i32
    %c0_i32_1 = arith.constant 0 : i32
    return %c0_i32, %c0_i32_0 : i32, i32
  }
  func.func @transform_8(%arg0: i32) -> (i32, i32) {
    %c0_i32 = arith.constant 0 : i32
    %c0_i32_0 = arith.constant 0 : i32
    %c0_i32_1 = arith.constant 0 : i32
    return %c0_i32, %c0_i32_0 : i32, i32
  }
  func.func @transform_9(%arg0: i32) -> (i32, i32) {
    %c0_i32 = arith.constant 0 : i32
    %c0_i32_0 = arith.constant 0 : i32
    %c0_i32_1 = arith.constant 0 : i32
    return %c0_i32, %c0_i32_0 : i32, i32
  }
  func.func @transform_10(%arg0: i32) -> (i32, i32) {
    %c0_i32 = arith.constant 0 : i32
    %c0_i32_0 = arith.constant 0 : i32
    %c0_i32_1 = arith.constant 0 : i32
    return %c0_i32, %c0_i32_0 : i32, i32
  }
  func.func @transform_11(%arg0: i32) -> (i32, i32) {
    %c0_i32 = arith.constant 0 : i32
    %c0_i32_0 = arith.constant 0 : i32
    return %arg0, %c0_i32 : i32, i32
  }
  func.func @transform_12(%arg0: i32) -> (i32, i32) {
    %c0_i32 = arith.constant 0 : i32
    %c0_i32_0 = arith.constant 0 : i32
    return %arg0, %c0_i32 : i32, i32
  }
}

</mosaic_0001>

<bundles_post_ra>
// kernel: tpu_custom_call.1
= control target key start
LH: loop header
LB: loop body
LE: loop exit
PB: predicated region body
PF: predicated region fallthrough
CT: control target
= control target key end

     0   :  { %s2781_s0 = inlined_call_operand.vmem [shape: f32[16,16], index: 0, kind: input, shape index: {}]   ;;  %s2782_s1 = inlined_call_operand.vmem [shape: f32[16,1], index: 1, kind: input, shape index: {}]   ;;  %s2783_s2 = inlined_call_operand.hbm [shape: f32[16,128], index: 2, kind: input, shape index: {}]   ;;  %s2784_s3 = inlined_call_operand.hbm [shape: bf16[16,512], index: 3, kind: input, shape index: {}]   ;;  %s2785_s4 = inlined_call_operand.hbm [shape: f32[1,512], index: 4, kind: input, shape index: {}]   ;;  %s2786_s5 = inlined_call_operand.hbm [shape: bf16[16,768], index: 5, kind: input, shape index: {}]   ;;  %s2787_s6 = inlined_call_operand.vmem [shape: f32[1,768], index: 6, kind: input, shape index: {}]   ;;  %s2788_s7 = inlined_call_operand.hbm [shape: bf16[128,128], index: 7, kind: input, shape index: {}]   ;;  %s2789_s8 = inlined_call_operand.hbm [shape: bf16[128,256], index: 8, kind: input, shape index: {}]   ;;  %s2790_s9 = inlined_call_operand.hbm [shape: bf16[128,128], index: 9, kind: input, shape index: {}]   ;;  %s2791_s10 = inlined_call_operand.hbm [shape: bf16[128,256], index: 10, kind: input, shape index: {}]   ;;  %s2792_s11 = inlined_call_operand.hbm [shape: f32[16,384], index: 11, kind: output, shape index: {0}]   ;;  %s2793_s12 = inlined_call_operand.hbm [shape: f32[16,1024], index: 12, kind: output, shape index: {1}]  }
   0x1   :  { %2797 = sst [smem:[#allocation26_spill]] %s2782_s1 }
   0x2   :  { %2798 = sst [smem:[#allocation27_spill]] %s2784_s3 }
   0x3   :  { %2799 = sst [smem:[#allocation28_spill]] %s2786_s5 }
   0x4   :  { %2800 = sst [smem:[#allocation29_spill]] %s2787_s6 }
   0x5   :  { %2801 = sst [smem:[#allocation30_spill]] %s2792_s11 }
   0x6   :  { %2802 = sst [smem:[#allocation31_spill]] %s2793_s12 }
   0x7   :  { %18 = vsyncpa [#allocation3], 0 }
   0x8   :  { %20 = vsyncpa [#allocation3 + $0x1], 0 }
   0x9   :  { %21 = vsyncpa [#allocation6], 0 }
   0xa   :  { %22 = vsyncpa [#allocation9], 0 }
   0xb   :  { %23 = vsyncpa [#allocation12], 0 }
   0xc   :  { %24 = vsyncpa [#allocation15], 0 }
   0xd   :  { %25 = vsyncpa [#allocation4], 0 }
   0xe   :  { %27 = vsyncpa [#allocation4 + $0x1], 0 }
   0xf   :  { %28 = vsyncpa [#allocation18], 0 }
  0x10   :  { %30 = vsyncpa [#allocation18 + $0x1], 0  ;;  %s2497_s21 = smov 0   ;;  %s2499_s22 = smov 0  }
  0x11   :  { %s2501_s23 = smov 0   ;;  %s2503_s24 = smov 0  }
  0x12 LB: > { %s2803_s3 = sld [smem:[#allocation27_spill]]  ;;  %s2521_s28 = sadd.s32 4294967295, %s2414_s24   ;;  %s2414_s24 = sphi %s2503_s24, %s2819_s24   ;;  %s2410_s23 = sphi %s2501_s23, %s2818_s23   ;;  %s2406_s22 = sphi %s2499_s22, %s2817_s22   ;;  %s2402_s21 = sphi %s2497_s21, %s2816_s21  }
  0x13   : > { %p1577_p0 = scmp.ge.s32.totalorder %s2414_s24, 1  ;;  %p109_p1 = scmp.eq.s32.totalorder %s2521_s28, 0 }
  0x14   : > { %p339_p2 = scmp.lt.s32.totalorder %s2414_s24, 3  ;;  %s2416_s30 = smov [#allocation5]  }
  0x15   : > { %s352_s13 = sshll.u32 %s2416_s30, 4  ;;  %s2805_s5 = sld [smem:[#allocation28_spill]]  ;;  %s353_s13 = int_to_ptr.vmem [resolvable:$true] %s352_s13 }
  0x16   : > { %p2526_p3 = pnand %p1577_p0, %p339_p2  ;;  %s2417_s18 = smov [#allocation8]  }
  0x17   : > { %s378_s19 = sshll.u32 %s2417_s18, 4  ;;  %s2418_s20 = smov 256   ;;  %s379_s19 = int_to_ptr.vmem [resolvable:$true] %s378_s19 }
  0x18   : > { %s350_s27 = sshll.u32 %s2803_s3, 4  ;;  %p1943_p4 = pneg %p2526_p3  ;;  %s351_s27 = int_to_ptr.hbm [resolvable:$true] %s350_s27 }
  0x19   : > { %s2419_s25 = smov 16   ;;  %s2420_s26 = smov 384  }
  0x1a   : > { %p2538_p6 = pnand %p1943_p4, %p109_p1  ;;  %s2421_s30 = smov 24  }
  0x1b   : > { %s376_s16 = sshll.u32 %s2805_s5, 4  ;;  %s407_s3 = sshll.u32 %s2789_s8, 4  ;;  %s377_s16 = int_to_ptr.hbm [resolvable:$true] %s376_s16  ;;  %s408_s3 = int_to_ptr.hbm [resolvable:$true] %s407_s3 }
  0x1c   : > { %1946 = dma.hbm_to_vmem [thread:$0]  (!%p2538_p6), %s351_s27, 512, %s353_s13, [#allocation6], %s2418_s20, %s2418_s20, %s2419_s25  }
  0x1d   : > { %1952 = dma.hbm_to_vmem [thread:$0]  (!%p2538_p6), %s377_s16, 768, %s379_s19, [#allocation9], %s2420_s26, %s2420_s26, %s2421_s30  }
  0x1e   : > { %s2422_s5 = smov [#allocation11]   ;;  %s365_s1 = sshll.u32 %s2785_s4, 4  ;;  %s366_s1 = int_to_ptr.hbm [resolvable:$true] %s365_s1 }
  0x1f   : > { %s409_s11 = sshll.u32 %s2422_s5, 4  ;;  %s2423_s6 = smov 128   ;;  %s410_s11 = int_to_ptr.vmem [resolvable:$true] %s409_s11 }
  0x20   : > { %s2424_s27 = smov 8   ;;  %s2425_s13 = smov [#allocation7]  }
  0x21   : > { %1958 = dma.hbm_to_vmem [thread:$0]  (!%p2538_p6), %s408_s3, 2048, %s410_s11, [#allocation12], %s2423_s6, %s2423_s6, %s2424_s27  }
  0x22   : > { %s367_s16 = sshll.u32 %s2425_s13, 4  ;;  %s393_s5 = sshll.u32 %s2788_s7, 4  ;;  %s368_s16 = int_to_ptr.vmem [resolvable:$true] %s367_s16  ;;  %s394_s5 = int_to_ptr.hbm [resolvable:$true] %s393_s5 }
  0x23   : > { %1949 = dma.hbm_to_vmem [thread:$0]  (!%p2538_p6), %s366_s1, 64, %s368_s16, [#allocation6]  }
  0x24   : > { %s2426_s12 = smov [#allocation10]   ;;  %s421_s3 = sshll.u32 %s2790_s9, 4  ;;  %s422_s3 = int_to_ptr.hbm [resolvable:$true] %s421_s3 }
  0x25   : > { %s395_s25 = sshll.u32 %s2426_s12, 4  ;;  %s2427_s11 = smov 64   ;;  %s396_s25 = int_to_ptr.vmem [resolvable:$true] %s395_s25 }
  0x26   : > { %s2428_s14 = smov 4   ;;  %s2429_s1 = smov [#allocation13]  }
  0x27   : > { %1955 = dma.hbm_to_vmem [thread:$0]  (!%p2538_p6), %s394_s5, 1024, %s396_s25, [#allocation9], %s2427_s11, %s2427_s11, %s2428_s14  }
  0x28   : > { %s423_s15 = sshll.u32 %s2429_s1, 4  ;;  %s435_s16 = sshll.u32 %s2791_s10, 4  ;;  %s424_s15 = int_to_ptr.vmem [resolvable:$true] %s423_s15  ;;  %s436_s16 = int_to_ptr.hbm [resolvable:$true] %s435_s16 }
  0x29   : > { %1961 = dma.hbm_to_vmem [thread:$0]  (!%p2538_p6), %s422_s3, 1024, %s424_s15, [#allocation12], %s2427_s11, %s2427_s11, %s2428_s14  }
  0x2a   : > { %s2430_s19 = smov [#allocation14]   ;;  %s1576_s5 = sadd.s32 4294967294, %s2414_s24  }
  0x2b   : > { %s437_s20 = sshll.u32 %s2430_s19, 4  ;;  %s2579_s12 = sadd.s32 1, %s2414_s24   ;;  %s438_s20 = int_to_ptr.vmem [resolvable:$true] %s437_s20 }
  0x2c   : > { %1964 = dma.hbm_to_vmem [thread:$0]  (!%p2538_p6), %s436_s16, 2048, %s438_s20, [#allocation15], %s2423_s6, %s2423_s6, %s2424_s27  }
  0x2d   : > { %s95_s25 = sadd.s32 1, %s2410_s23  ;;  %s92_s26 = ssub.s32 %s2414_s24, %s2579_s12 }
  0x2e   : > { %p102_p7 = scmp.ne.s32.totalorder %s2410_s23, %s2406_s22  ;;  %p93_p8 = scmp.eq.s32.totalorder %s92_s26, 0 }
  0x2f   : > { %p103_p9 = scmp.eq.s32.totalorder %s2414_s24, 0  ;;  %p108_p10 = scmp.ne.s32.totalorder %s2406_s22, %s2402_s21 }
  0x30   : > { %p300_p11 = scmp.eq.s32.totalorder %s2521_s28, 1  ;;  %p306_p0 = scmp.eq.s32.totalorder %s1576_s5, 1 }
  0x31   : > { %s2591_s30 = scalar_select %p93_p8, %s2410_s23, %s95_s25  }
  0x32   : > { %p2595_p12 = por %p109_p1, %p108_p10  ;;  %p2599_p13 = por %p300_p11, %p102_p7 }
  0x33   : > { %p104_p2 = por %p103_p9, %p102_p7  ;;  %s465_s27 = sand.u32 1, %s2410_s23  }
  0x34   : > { %p2604_p4 = por %p306_p0, %p108_p10  ;;  %p1983_p6 = scmp.lt.s32.totalorder %s2414_s24, 2 }
  0x35   : > { %s1586_s11 = sshll.u32 %s465_s27, 3  ;;  %s1587_s14 = sshll.u32 %s2414_s24, 3 }
  0x36   : > { %s473_s18 = scalar_lea.hbm %s2783_s2, %s1587_s14  ;;  %s469_s16 = scalar_lea.vmem [#allocation2], %s1586_s11 }
  0x37   : > { %s475_s13 = sshll.u32 %s473_s18, 4  ;;  %s477_s19 = sshll.u32 %s469_s16, 4  ;;  %s476_s13 = int_to_ptr.hbm [resolvable:$true] %s475_s13  ;;  %s478_s19 = int_to_ptr.vmem [resolvable:$true] %s477_s19 }
  0x38   : > { %p2613_p8 = pnand %p1983_p6, %p104_p2  ;;  %s466_s5 = scalar_lea.sflag [#allocation3], %s465_s27 }
  0x39   : > { %s2270_s25 = sshra.s32 %s476_s13, 4  ;;  %s2277_s11 = scalar_lea.hbm %s2783_s2, 16  ;;  %s2271_s25 = int_to_ptr.hbm [resolvable:$true] %s2270_s25 }
  0x3a   : > { %s2272_s26 = scalar_lea.hbm %s2271_s25, 8  ;;  %p2274_p9 = pneg %p2613_p8 }
  0x3b   : > { %p2273_p7 = scmp.ne.s32.totalorder %s2271_s25, %s2272_s26  ;;  %p2278_p0 = scmp.lt.s32.totalorder %s2271_s25, %s2783_s2 }
  0x3c   : > { %p2279_p2 = scmp.lt.s32.totalorder %s2277_s11, %s2272_s26 }
  0x3d   : > { %p2275_p10 = pnand %p2274_p9, %p2273_p7 }
  0x3e   : > { %p2280_p6 = por %p2279_p2, %p2278_p0 }
  0x3f   : > { %p2276_p11 = pneg %p2275_p10 }
  0x41   : > { %p2281_p5 = pnand %p2280_p6, %p2276_p11 }
  0x43   : > { %2284 = shalt.err (!%p2281_p5)
}
  0x44   : > { %1968 = dma.hbm_to_vmem [thread:$0]  (!%p2613_p8), %s476_s13, 128, %s478_s19, %s466_s5  }
  0x45   : > { %486 = sbr.rel (%p2526_p3) target bundleno = 620 (0x26c), region = 64  ;;  %s2630_s27 = sand.u32 (!%p2526_p3), 1, %s2406_s22  }
  0x46   : > { %s1589_s16 = sshll.u32 (!%p2526_p3), %s2630_s27, 3  ;;  %s489_s14 = scalar_lea.sflag (!%p2526_p3), [#allocation3], %s2630_s27 }
  0x47   : > { %s2634_s1 = scalar_lea.vmem (!%p2526_p3), [#allocation2], %s1589_s16 }
  0x4a   : > { %2373 = dma.done.wait (%p2595_p12), %s489_s14, 128  }
  0x4b   : > { %2375 = vsyncadd (%p2595_p12), %s489_s14, 4294967168 }
  0x4c   : > { %2377 = dma.done.wait (%p109_p1), [#allocation6], 576  }
  0x4d   : > { %2379 = vsyncadd (%p109_p1), [#allocation6], 4294966720 }
  0x4e   : > { %2381 = dma.done.wait (%p109_p1), [#allocation9], 1792  }
  0x4f   : > { %2383 = vsyncadd (%p109_p1), [#allocation9], 4294965504 }
  0x50   : > { %2385 = dma.done.wait (%p109_p1), [#allocation12], 3072  }
  0x51   : > { %2387 = vsyncadd (%p109_p1), [#allocation12], 4294964224 }
  0x52   : > { %2389 = dma.done.wait (%p109_p1), [#allocation15], 2048  }
  0x53   : > { %2391 = vsyncadd (%p109_p1), [#allocation15], 4294965248  ;;  %p582_p3 = scmp.lt.s32.totalorder %s2521_s28, 1  ;;  %v1602_v0 = vld [vmem:[#allocation5] sm:$0xf]  ;;  %vm627_vm0 = vcmask 130048  }
  0x54   : > { %v1850_v1 = vld [vmem:[#allocation5 + $0xc] sm:$0xf0]  ;;  %v1848_v2 = vld [vmem:[#allocation5 + $0x4] sm:$0xf]  ;;  %v1604_v4 = vld [vmem:[#allocation5 + $0x10] sm:$0xf0] }
  0x55   : > { %s2658_s29 = scalar_select %p582_p3, %s2521_s28, 1  ;;  %v1603_v3 = vor.u32 %v1850_v1, %v1602_v0  ;;  %v1610_v6 = vld [vmem:[#allocation5 + $0x8] sm:$0xf]  ;;  %v1607_v7 = vor.u32 %v1848_v2, %v1604_v4  ;;  %v1851_v9 = vld [vmem:[#allocation5 + $0x14] sm:$0xf0]  ;;  %v1859_v20 = vld [vmem:[#allocation10 + $0x38] sm:$0xff] }
  0x56   : > { %v1849_v10 = vld [vmem:[#allocation5 + $0xc] sm:$0xf]  ;;  %v1612_v11 = vld [vmem:[#allocation5 + $0x18] sm:$0xf0]  ;;  %v1611_v12 = vor.u32 %v1851_v9, %v1610_v6  ;;  %v1661_v15 = vld [vmem:[#allocation8 + $0x1c] sm:$0xf0] }
  0x57   : > { %s1598_s17 = sshll.u32 %s2658_s29, 3  ;;  %638 = vmatpush.bf16.msra.mxu0 %v1603_v3  ;;  %v1615_v13 = vor.u32 %v1849_v10, %v1612_v11  ;;  %v1877_v14 = vld [vmem:[#allocation8 + $0x8] sm:$0xf]  ;;  %651 = vmatpush.bf16.msra.mxu1 %v1607_v7  ;;  %v1622_v17 = vld [vmem:[#allocation8] sm:$0xf]  ;;  %v1857_v44 = vld [vmem:[#allocation10 + $0x28] sm:$0xff] }
  0x58   : > { %s585_s20 = scalar_lea.vmem %s2781_s0, %s1598_s17  ;;  %v1664_v16 = vor.u32 %v1877_v14, %v1661_v15  ;;  %v1860_v18 = vld [vmem:[#allocation8 + $0x14] sm:$0xf0]  ;;  %v1659_v19 = vld [vmem:[#allocation8 + $0x4] sm:$0xf]  ;;  %664 = vmatpush.bf16.msra.mxu2 %v1611_v12  ;;  %v1878_v22 = vld [vmem:[#allocation8 + $0x18] sm:$0xf0] }
  0x59   : > { %v591_v5 = vld [vmem:[%s585_s20] sm:$0xff]  ;;  %677 = vmatpush.bf16.msra.mxu3 %v1615_v13  ;;  %v1623_v21 = vor.u32 %v1860_v18, %v1622_v17  ;;  %v1725_v23 = vld [vmem:[#allocation11 + $0x70] sm:$0xf]  ;;  %v1660_v24 = vor.u32 %v1878_v22, %v1659_v19  ;;  %v1876_v25 = vld [vmem:[#allocation11 + $0x74] sm:$0xf0]  ;;  %s2811_s26 = sld [smem:[#allocation29_spill]] }
  0x5a   : > { %v2666_v8 = vpack.c.bf16 %v591_v5, %v591_v5  ;;  %v1875_v26 = vld [vmem:[#allocation11 + $0x74] sm:$0xf]  ;;  %v1727_v27 = vld [vmem:[#allocation11 + $0x78] sm:$0xf0]  ;;  %v1726_v28 = vor.u32 %v1876_v25, %v1725_v23  ;;  %v1717_v30 = vld [vmem:[#allocation11 + $0x60] sm:$0xf] }
  0x5b   : > { %724 = vmatpush.bf16.msrb.mxu0 %v1623_v21  ;;  %v1730_v29 = vor.u32 %v1875_v26, %v1727_v27  ;;  %v1874_v31 = vld [vmem:[#allocation11 + $0x64] sm:$0xf0]  ;;  %v1873_v32 = vld [vmem:[#allocation11 + $0x64] sm:$0xf]  ;;  %v1719_v33 = vld [vmem:[#allocation11 + $0x68] sm:$0xf0]  ;;  %778 = vmatpush.bf16.msrb.mxu1 %v1859_v20 }
  0x5c   : > { %1616 = vmatmul.msk.bf16.vlgmr.msra.gmra.mxu0 %vm627_vm0, %v2666_v8  ;;  %1617 = vmatmul.msk.bf16.vlgmr.msra.gmra.mxu1 %vm627_vm0, %v2666_v8  ;;  %v1858_v34 = vld [vmem:[#allocation10 + $0x30] sm:$0xff]  ;;  %v1718_v35 = vor.u32 %v1874_v31, %v1717_v30  ;;  %v1722_v36 = vor.u32 %v1873_v32, %v1719_v33  ;;  %v1733_v38 = vld [vmem:[#allocation8 + $0xc] sm:$0xf]  ;;  %v1872_v40 = vld [vmem:[#allocation11 + $0x54] sm:$0xf0]  ;;  %s1597_s18 = sshll.u32 %s2630_s27, 6 }
  0x5d   : > { %882 = vmatpush.bf16.msrb.mxu3 %v1664_v16  ;;  %1618 = vmatmul.msk.bf16.vlgmr.msra.gmra.mxu2 %vm627_vm0, %v2666_v8  ;;  %v1709_v37 = vld [vmem:[#allocation11 + $0x50] sm:$0xf]  ;;  %v1887_v39 = vld [vmem:[#allocation8 + $0x20] sm:$0xf0]  ;;  %v1711_v42 = vld [vmem:[#allocation11 + $0x58] sm:$0xf0] }
  0x5e   : > { %1619 = vmatmul.msk.bf16.vlgmr.msra.gmra.mxu3 %vm627_vm0, %v2666_v8  ;;  %869 = vmatpush.bf16.msrb.mxu2 %v1660_v24  ;;  %v1871_v41 = vld [vmem:[#allocation11 + $0x54] sm:$0xf]  ;;  %v1734_v43 = vor.u32 %v1887_v39, %v1733_v38  ;;  %v1710_v45 = vor.u32 %v1872_v40, %v1709_v37  ;;  %v1701_v47 = vld [vmem:[#allocation11 + $0x40] sm:$0xf]  ;;  %v1870_v48 = vld [vmem:[#allocation11 + $0x44] sm:$0xf0] }
  0x5f   : > { %972 = vmatpush.bf16.msra.mxu0 %v1726_v28  ;;  %779 = vmatpush.bf16.msrb.mxu1 %v1858_v34  ;;  %v1714_v46 = vor.u32 %v1871_v41, %v1711_v42  ;;  %v1869_v49 = vld [vmem:[#allocation11 + $0x44] sm:$0xf]  ;;  %v1703_v50 = vld [vmem:[#allocation11 + $0x48] sm:$0xf0]  ;;  %v1770_v52 = vld [vmem:[#allocation8 + $0x10] sm:$0xf]  ;;  %v1702_v54 = vor.u32 %v1870_v48, %v1701_v47 }
  0x60   : > { %v1856_v51 = vld [vmem:[#allocation10 + $0x20] sm:$0xff]  ;;  %v1905_v53 = vld [vmem:[#allocation8 + $0x24] sm:$0xf0]  ;;  %v1706_v55 = vor.u32 %v1869_v49, %v1703_v50  ;;  %v1693_v56 = vld [vmem:[#allocation11 + $0x30] sm:$0xf]  ;;  %s2701_s16 = scalar_lea.vmem [#allocation17], %s1597_s18 }
  0x61   : > { %1057 = vmatpush.bf16.msra.mxu3 %v1734_v43  ;;  %v1868_v57 = vld [vmem:[#allocation11 + $0x34] sm:$0xf0]  ;;  %v1867_v58 = vld [vmem:[#allocation11 + $0x34] sm:$0xf]  ;;  %v1695_v59 = vld [vmem:[#allocation11 + $0x38] sm:$0xf0]  ;;  %v1771_v60 = vor.u32 %v1905_v53, %v1770_v52 }
  0x62   : > { %985 = vmatpush.bf16.msra.mxu2 %v1730_v29  ;;  %v1855_v61 = vld [vmem:[#allocation10 + $0x18] sm:$0xff]  ;;  %v1694_v62 = vor.u32 %v1868_v57, %v1693_v56  ;;  %v1698_v63 = vor.u32 %v1867_v58, %v1695_v59  ;;  %v1854_v0 = vld [vmem:[#allocation10 + $0x10] sm:$0xff]  ;;  %v1900_v4 = vld [vmem:[#allocation14 + $0x64] sm:$0xf]  ;;  %s1907_s5 = smul.u32 24, %s2630_s27  ;;  %s2812_s15 = sld [smem:[#allocation26_spill]] }
  0x63   : > { %973 = vmatpush.bf16.msra.mxu0 %v1718_v35  ;;  %780 = vmatpush.bf16.msrb.mxu1 %v1857_v44  ;;  %v1902_v1 = vld [vmem:[#allocation14 + $0x74] sm:$0xf]  ;;  %v1838_v2 = vld [vmem:[#allocation14 + $0x78] sm:$0xf0]  ;;  %v1830_v5 = vld [vmem:[#allocation14 + $0x68] sm:$0xf0] }
  0x64   : > { %v1841_v3 = vor.u32 %v1902_v1, %v1838_v2  ;;  %v1833_v6 = vor.u32 %v1900_v4, %v1830_v5  ;;  %v1685_v7 = vld [vmem:[#allocation11 + $0x20] sm:$0xf]  ;;  %v1866_v9 = vld [vmem:[#allocation11 + $0x24] sm:$0xf0]  ;;  %v1865_v10 = vld [vmem:[#allocation11 + $0x24] sm:$0xf] }
  0x65   : > { %v1853_v11 = vld [vmem:[#allocation10 + $0x8] sm:$0xff]  ;;  %v1686_v12 = vor.u32 %v1866_v9, %v1685_v7  ;;  %v1898_v14 = vld [vmem:[#allocation14 + $0x54] sm:$0xf]  ;;  %v1822_v16 = vld [vmem:[#allocation14 + $0x58] sm:$0xf0]  ;;  %s2713_s25 = scalar_lea.vmem [#allocation16], %s1907_s5 }
  0x66   : > { %986 = vmatpush.bf16.msra.mxu2 %v1722_v36  ;;  %v1687_v13 = vld [vmem:[#allocation11 + $0x28] sm:$0xf0]  ;;  %v1825_v17 = vor.u32 %v1898_v14, %v1822_v16  ;;  %v1677_v18 = vld [vmem:[#allocation11 + $0x10] sm:$0xf]  ;;  %v1864_v19 = vld [vmem:[#allocation11 + $0x14] sm:$0xf0] }
  0x67   : > { %974 = vmatpush.bf16.msra.mxu0 %v1710_v45  ;;  %781 = vmatpush.bf16.msrb.mxu1 %v1856_v51  ;;  %v1690_v15 = vor.u32 %v1865_v10, %v1687_v13  ;;  %v1863_v20 = vld [vmem:[#allocation11 + $0x14] sm:$0xf]  ;;  %v1852_v21 = vld [vmem:[#allocation10] sm:$0xff]  ;;  %v1678_v22 = vor.u32 %v1864_v19, %v1677_v18  ;;  %v1679_v23 = vld [vmem:[#allocation11 + $0x18] sm:$0xf0]  ;;  %s1906_s29 = sshll.u32 %s2521_s28, 6 }
  0x68   : > { %v1896_v24 = vld [vmem:[#allocation14 + $0x44] sm:$0xf]  ;;  %v1682_v25 = vor.u32 %v1863_v20, %v1679_v23  ;;  %v1814_v26 = vld [vmem:[#allocation14 + $0x48] sm:$0xf0]  ;;  %v1669_v28 = vld [vmem:[#allocation11] sm:$0xf]  ;;  %s589_s18 = scalar_lea.vmem %s2812_s15, %s1598_s17 }
  0x69   : > { %v1817_v27 = vor.u32 %v1896_v24, %v1814_v26  ;;  %v1862_v29 = vld [vmem:[#allocation11 + $0x4] sm:$0xf0]  ;;  %v1861_v30 = vld [vmem:[#allocation11 + $0x4] sm:$0xf]  ;;  %v1671_v32 = vld [vmem:[#allocation11 + $0x8] sm:$0xf0] }
  0x6a   : > { %987 = vmatpush.bf16.msra.mxu2 %v1714_v46  ;;  %v1670_v31 = vor.u32 %v1862_v29, %v1669_v28  ;;  %v1894_v33 = vld [vmem:[#allocation14 + $0x34] sm:$0xf]  ;;  %v1806_v34 = vld [vmem:[#allocation14 + $0x38] sm:$0xf0]  ;;  %v1674_v35 = vor.u32 %v1861_v30, %v1671_v32  ;;  %v1892_v37 = vld [vmem:[#allocation14 + $0x24] sm:$0xf] }
  0x6b   : > { %975 = vmatpush.bf16.msra.mxu0 %v1702_v54  ;;  %782 = vmatpush.bf16.msrb.mxu1 %v1855_v61  ;;  %v1809_v36 = vor.u32 %v1894_v33, %v1806_v34  ;;  %v1798_v38 = vld [vmem:[#allocation14 + $0x28] sm:$0xf0]  ;;  %v1890_v40 = vld [vmem:[#allocation14 + $0x14] sm:$0xf]  ;;  %v1790_v41 = vld [vmem:[#allocation14 + $0x18] sm:$0xf0] }
  0x6c   : > { %1624 = vmatmul.msk.bf16.vlgmr.msrb.gmra.mxu0 %vm627_vm0, %v2666_v8  ;;  %v1801_v39 = vor.u32 %v1892_v37, %v1798_v38  ;;  %v1793_v42 = vor.u32 %v1890_v40, %v1790_v41  ;;  %v1888_v43 = vld [vmem:[#allocation14 + $0x4] sm:$0xf]  ;;  %v1782_v44 = vld [vmem:[#allocation14 + $0x8] sm:$0xf0]  ;;  %v1886_v45 = vld [vmem:[#allocation13 + $0x38] sm:$0xff]  ;;  %s2813_s13 = sld [smem:[#allocation31_spill]] }
  0x6d   : > { %1665 = vmatmul.msk.bf16.vlgmr.msrb.gmra.mxu2 %vm627_vm0, %v2666_v8  ;;  %v1785_v46 = vor.u32 %v1888_v43, %v1782_v44  ;;  %v1904_v47 = vld [vmem:[#allocation8 + $0x14] sm:$0xf]  ;;  %v1772_v48 = vld [vmem:[#allocation8 + $0x28] sm:$0xf0]  ;;  %v1885_v49 = vld [vmem:[#allocation13 + $0x30] sm:$0xff]  ;;  %s1379_s20 = sshll.u32 %s2701_s16, 4  ;;  %s1380_s20 = int_to_ptr.vmem [resolvable:$true] %s1379_s20 }
  0x6e   : > { %988 = vmatpush.bf16.msra.mxu2 %v1706_v55  ;;  %1666 = vmatmul.msk.bf16.vlgmr.msrb.gmra.mxu3 %vm627_vm0, %v2666_v8  ;;  %v1775_v50 = vor.u32 %v1904_v47, %v1772_v48  ;;  %v597_v51 = vld [vmem:[#allocation7] sm:$0xf]  ;;  %v1836_v54 = vld [vmem:[#allocation14 + $0x70] sm:$0xf]  ;;  %v1903_v55 = vld [vmem:[#allocation14 + $0x74] sm:$0xf0] }
  0x6f   : > { %1170 = vmatpush.bf16.msrb.mxu3 %v1771_v60  ;;  %976 = vmatpush.bf16.msra.mxu0 %v1694_v62  ;;  %v1884_v52 = vld [vmem:[#allocation13 + $0x28] sm:$0xff]  ;;  %v599_v53 = vperm.slane %v597_v51, 0  ;;  %v600_v56 = vperm.slane %v597_v51, 1  ;;  %v1883_v57 = vld [vmem:[#allocation13 + $0x20] sm:$0xff]  ;;  %v1837_v58 = vor.u32 %v1903_v55, %v1836_v54  ;;  %v1820_v1 = vld [vmem:[#allocation14 + $0x50] sm:$0xf]  ;;  %v791_v55 = vlaneseq }
  0x70   : > { %783 = vmatpush.bf16.msrb.mxu1 %v1854_v0  ;;  %v1828_v59 = vld [vmem:[#allocation14 + $0x60] sm:$0xf]  ;;  %v1901_v60 = vld [vmem:[#allocation14 + $0x64] sm:$0xf0]  ;;  %v1899_v2 = vld [vmem:[#allocation14 + $0x54] sm:$0xf0] }
  0x71   : > { %v1829_v62 = vor.u32 %v1901_v60, %v1828_v59  ;;  %v1882_v4 = vld [vmem:[#allocation13 + $0x18] sm:$0xff]  ;;  %v1821_v7 = vor.u32 %v1899_v2, %v1820_v1  ;;  %v601_v9 = vperm.slane %v597_v51, 2  ;;  %v1812_v13 = vld [vmem:[#allocation14 + $0x40] sm:$0xf]  ;;  %v1897_v14 = vld [vmem:[#allocation14 + $0x44] sm:$0xf0] }
  0x72   : > { %989 = vmatpush.bf16.msra.mxu2 %v1698_v63  ;;  %v1880_v24 = vld [vmem:[#allocation13 + $0x8] sm:$0xff]  ;;  %v1895_v26 = vld [vmem:[#allocation14 + $0x34] sm:$0xf0]  ;;  %v1796_v32 = vld [vmem:[#allocation14 + $0x20] sm:$0xf]  ;;  %s1377_s19 = scalar_lea.hbm %s2813_s13, %s1906_s29  ;;  %s2320_s17 = scalar_lea.hbm %s2813_s13, 128 }
  0x73   : > { %977 = vmatpush.bf16.msra.mxu0 %v1686_v12  ;;  %v1881_v12 = vld [vmem:[#allocation13 + $0x10] sm:$0xff]  ;;  %v1893_v33 = vld [vmem:[#allocation14 + $0x24] sm:$0xf0]  ;;  %v1891_v41 = vld [vmem:[#allocation14 + $0x14] sm:$0xf0]  ;;  %s1381_s5 = sshll.u32 %s1377_s19, 4  ;;  %s1382_s5 = int_to_ptr.hbm [resolvable:$true] %s1381_s5 }
  0x74   : > { %784 = vmatpush.bf16.msrb.mxu1 %v1853_v11  ;;  %v602_v11 = vperm.slane %v597_v51, 3  ;;  %v1788_v40 = vld [vmem:[#allocation14 + $0x10] sm:$0xf]  ;;  %v1780_v43 = vld [vmem:[#allocation14] sm:$0xf]  ;;  %s2314_s11 = sshra.s32 %s1382_s5, 4  ;;  %s2315_s11 = int_to_ptr.hbm [resolvable:$true] %s2314_s11 }
  0x75   : > { %v1889_v44 = vld [vmem:[#allocation14 + $0x4] sm:$0xf0]  ;;  %s2316_s15 = scalar_lea.hbm %s2315_s11, 64  ;;  %p2321_p8 = scmp.lt.s32.totalorder %s2315_s11, %s2813_s13 }
  0x76   : > { %990 = vmatpush.bf16.msra.mxu2 %v1690_v15  ;;  %p2317_p1 = scmp.ne.s32.totalorder %s2315_s11, %s2316_s15  ;;  %p2322_p7 = scmp.lt.s32.totalorder %s2320_s17, %s2316_s15 }
  0x77   : > { %978 = vmatpush.bf16.msra.mxu0 %v1678_v22 }
  0x78   : > { %785 = vmatpush.bf16.msrb.mxu1 %v1852_v21  ;;  %v1813_v21 = vor.u32 %v1897_v14, %v1812_v13  ;;  %p2318_p5 = pnand %p2317_p1, %p2599_p13  ;;  %p2323_p9 = por %p2322_p7, %p2321_p8 }
  0x7a   : > { %991 = vmatpush.bf16.msra.mxu2 %v1682_v25  ;;  %v1804_v25 = vld [vmem:[#allocation14 + $0x30] sm:$0xf]  ;;  %p2319_p12 = pneg %p2318_p5 }
  0x7b   : > { %979 = vmatpush.bf16.msra.mxu0 %v1670_v31  ;;  %v1805_v29 = vor.u32 %v1895_v26, %v1804_v25  ;;  %v1879_v31 = vld [vmem:[#allocation13] sm:$0xff] }
  0x7c   : > { %1111 = vmatpush.bf16.msra.mxu1 %v1886_v45  ;;  %p2324_p10 = pnand %p2323_p9, %p2319_p12 }
  0x7e   : > { %1735 = vmatmul.msk.bf16.vlgmr.msra.gmra.mxu3 %vm627_vm0, %v2666_v8  ;;  %992 = vmatpush.bf16.msra.mxu2 %v1674_v35 }
  0x7f   : > { %1286 = vmatpush.bf16.msra.mxu3 %v1841_v3  ;;  %1183 = vmatpush.bf16.msrb.mxu0 %v1775_v50 }
  0x80   : > { %1112 = vmatpush.bf16.msra.mxu1 %v1885_v49 }
  0x82   : > { %1273 = vmatpush.bf16.msrb.mxu2 %v1837_v58  ;;  %v2694_v58 = vand.u32 127, %v791_v55 }
  0x83   : > { %1287 = vmatpush.bf16.msra.mxu3 %v1833_v6 }
  0x84   : > { %1113 = vmatpush.bf16.msra.mxu1 %v1884_v52  ;;  %vm793_vm1 = vcmp.lt.s32.totalorder %v2694_v58, 48  ;;  %vm1322_vm8 = vcmp.lt.s32.totalorder %v2694_v58, 24 }
  0x86   : > { %1274 = vmatpush.bf16.msrb.mxu2 %v1829_v62 }
  0x87   : > { %1288 = vmatpush.bf16.msra.mxu3 %v1825_v17 }
  0x88   : > { %1114 = vmatpush.bf16.msra.mxu1 %v1883_v57  ;;  %v846_v57 = vld [vmem:[%s2811_s26 + $0x1] sm:$0x3] }
  0x89   : > { %v848_v59 = vperm.slane %v846_v57, 0 }
  0x8a   : > { %1275 = vmatpush.bf16.msrb.mxu2 %v1821_v7 }
  0x8b   : > { %1289 = vmatpush.bf16.msra.mxu3 %v1817_v27 }
  0x8c   : > { %1115 = vmatpush.bf16.msra.mxu1 %v1882_v4 }
  0x8e   : > { %1776 = vmatmul.msk.bf16.vlgmr.msrb.gmra.mxu3 %vm627_vm0, %v2666_v8  ;;  %1276 = vmatpush.bf16.msrb.mxu2 %v1813_v21 }
  0x8f   : > { %1290 = vmatpush.bf16.msra.mxu3 %v1809_v36  ;;  %v1797_v36 = vor.u32 %v1893_v33, %v1796_v32 }
  0x90   : > { %1116 = vmatpush.bf16.msra.mxu1 %v1881_v12  ;;  %v1147_v12 = vld [vmem:[%s2811_s26 + $0x4] sm:$0x3] }
  0x92   : > { %1277 = vmatpush.bf16.msrb.mxu2 %v1805_v29 }
  0x93   : > { %1291 = vmatpush.bf16.msra.mxu3 %v1801_v39 }
  0x94   : > { %1117 = vmatpush.bf16.msra.mxu1 %v1880_v24  ;;  %v1149_v24 = vperm.slane %v1147_v12, 0 }
  0x96   : > { %1278 = vmatpush.bf16.msrb.mxu2 %v1797_v36 }
  0x97   : > { %1292 = vmatpush.bf16.msra.mxu3 %v1793_v42  ;;  %v1789_v42 = vor.u32 %v1891_v41, %v1788_v40 }
  0x98   : > { %1118 = vmatpush.bf16.msra.mxu1 %v1879_v31 }
  0x9a   : > { %1279 = vmatpush.bf16.msrb.mxu2 %v1789_v42 }
  0x9b   : > { %1293 = vmatpush.bf16.msra.mxu3 %v1785_v46  ;;  %v1781_v46 = vor.u32 %v1889_v44, %v1780_v43  ;;  %v1013_v44 = vld [vmem:[%s2634_s1] sm:$0xff]  ;;  %s1351_s1 = scalar_lea.sflag [#allocation18], %s2630_s27 }
  0x9e   : > { %1280 = vmatpush.bf16.msrb.mxu2 %v1781_v46 }
  0xd9   : > { %v640_v61 = vpop.f32.mrf.mxu0  ;;  %v653_v0 = vpop.f32.mrf.mxu1 }
  0xda   : > { %v641_v63 = vadd.f32 %v640_v61, %v599_v53  ;;  %v654_v3 = vadd.f32 %v653_v0, %v600_v56  ;;  %v2042_v56 = vld [vmem:[%s2811_s26] ss:$0 sm:$0xff] }
  0xdc   : > { %v683_v5 = vmax.f32 %v641_v63, 0.0  ;;  %v684_v6 = vmax.f32 %v654_v3, 0.0  ;;  %v849_v63 = vperm.slane %v846_v57, 1 }
  0xde   : > { %v687_v10 = vpack.c.bf16 %v684_v6, %v683_v5  ;;  %v2043_v5 = vld [vmem:[%s2811_s26 + $0x3] ss:$0 sm:$0xff] }
  0xe0   : > { %v889_v15 = vunpack.c.h.b16 %v687_v10  ;;  %786 = vmatmul.bf16.vlgmr.msrb.gmra.mxu1 %v687_v10  ;;  %v666_v17 = vpop.f32.mrf.mxu2 }
  0xe1   : > { %v642_v16 = vpop.f32.mrf.mxu0  ;;  %v655_v18 = vpop.f32.mrf.mxu1  ;;  %v667_v19 = vadd.f32 %v666_v17, %v601_v9 }
  0xe2   : > { %v679_v20 = vpop.f32.mrf.mxu3  ;;  %v890_v22 = vpack.c.b16 %v889_v15, %v889_v15  ;;  %v1150_v15 = vperm.slane %v1147_v12, 1 }
  0xe3   : > { %v680_v23 = vadd.f32 %v679_v20, %v602_v11  ;;  %v685_v27 = vmax.f32 %v667_v19, 0.0 }
  0xe4   : > { %980 = vmatmul.bf16.vlgmr.msra.gmra.mxu0 %v890_v22  ;;  %993 = vmatmul.bf16.vlgmr.msra.gmra.mxu2 %v890_v22 }
  0xe5   : > { %v686_v28 = vmax.f32 %v680_v23, 0.0 }
  0xe7   : > { %v688_v30 = vpack.c.bf16 %v686_v28, %v685_v27 }
  0xe8   : > { %v668_v35 = vpop.f32.mrf.mxu2 }
  0xe9   : > { %v1190_v34 = vunpack.c.h.b16 %v688_v30  ;;  %v726_v38 = vpop.f32.mrf.mxu0 }
  0xea   : > { %v681_v37 = vpop.f32.mrf.mxu3 }
  0xeb   : > { %v1191_v39 = vpack.c.b16 %v1190_v34, %v1190_v34 }
  0xed   : > { %1294 = vmatmul.bf16.vlgmr.msra.gmra.mxu3 %v1191_v39 }
  0xf0   : > { %1119 = vmatmul.bf16.vlgmr.msra.gmra.mxu1 %v688_v30  ;;  %v871_v45 = vpop.f32.mrf.mxu2 }
  0xf1   : > { %v728_v48 = vpop.f32.mrf.mxu0  ;;  %v872_v61 = vadd.f32 %v871_v45, %v848_v59 }
  0xf2   : > { %v884_v47 = vpop.f32.mrf.mxu3 }
  0xf3   : > { %v885_v3 = vadd.f32 %v884_v47, %v849_v63 }
  0xf4   : > { %1777 = vmatmul.msk.bf16.vlgmr.msrb.gmra.mxu0 %vm627_vm0, %v2666_v8  ;;  %1281 = vmatmul.bf16.vlgmr.msrb.gmra.mxu2 %v1191_v39  ;;  %v727_v8 = vadd.f32 %v2042_v56, %v726_v38 }
  0xf8   : > { %v873_v49 = vpop.f32.mrf.mxu2 }
  0xfa   : > { %v886_v50 = vpop.f32.mrf.mxu3 }
 0x102   : > { %v1059_v51 = vpop.f32.mrf.mxu3 }
 0x103   : > { %v1060_v10 = vadd.f32 %v2043_v5, %v1059_v51 }
 0x10a   : > { %v1061_v52 = vpop.f32.mrf.mxu3 }
 0x112   : > { %v1172_v53 = vpop.f32.mrf.mxu3 }
 0x113   : > { %v1173_v31 = vadd.f32 %v1172_v53, %v1149_v24 }
 0x11a   : > { %v1174_v54 = vpop.f32.mrf.mxu3 }
 0x15d   : > { %v787_v60 = vpop.f32.mrf.mxu1 }
 0x15e   : > { %v788_v62 = vadd.f32 %v787_v60, %v727_v8 }
 0x160   : > { %v2698_v0 = vsel %vm793_vm1, %v788_v62, -1e+30 }
 0x161   : > { %v981_v1 = vpop.f32.mrf.mxu0  ;;  %797 = vmax.xlane.f32.xlu0 %v2698_v0 }
 0x162   : > { %v982_v2 = vadd.f32 %v981_v1, %v872_v61 }
 0x164   : > { %1018 = vst [vmem:[%s2701_s16] sm:$0xff] %v982_v2 }
 0x165   : > { %v789_v4 = vpop.f32.mrf.mxu1 }
 0x166   : > { %v2431_v4 = vmov 0  }
 0x167   : > { %v994_v6 = vpop.f32.mrf.mxu2  ;;  %2040 = vset.pattern.permute.xlu1 %v2431_v4  ;;  %2041 = vset.pattern.permute.xlu0 %v2431_v4 }
 0x168   : > { %v995_v7 = vadd.f32 %v994_v6, %v885_v3  ;;  %v820_v3 = vld [vmem:[%s589_s18] sm:$0xff] }
 0x169   : > { %v983_v9 = vpop.f32.mrf.mxu0 }
 0x16a   : > { %v999_v11 = vmin.f32 %v995_v7, 20.0  ;;  %vm998_vm3 = vcmp.gt.f32.partialorder %v995_v7, 20.0 }
 0x16c   : > { %v1000_v13 = vmul.f32 1.442695, %v999_v11 }
 0x16d   : > { %v1120_v14 = vpop.f32.mrf.mxu1 }
 0x16e   : > { %2044 = vpow2.f32 %v1000_v13  ;;  %v1121_v16 = vadd.f32 %v1120_v14, %v1060_v10 }
 0x16f   : > { %v996_v17 = vpop.f32.mrf.mxu2 }
 0x170   : > { %v1295_v18 = vpop.f32.mrf.mxu3  ;;  %v1124_v19 = vmax.f32 %v1121_v16, 0.0 }
 0x171   : > { %v1185_v20 = vpop.f32.mrf.mxu0 }
 0x172   : > { %v1186_v21 = vadd.f32 %v1185_v20, %v1150_v15  ;;  %v1125_v22 = vadd.f32 1.0, %v1124_v19 }
 0x174   : > { %v2045_v23 = vpop.eup %2044  ;;  %v1296_v25 = vadd.f32 %v1295_v18, %v1186_v21  ;;  %1127 = vst [vmem:[%s2701_s16 + $0x20] sm:$0xff] %v1125_v22 }
 0x175   : > { %v1002_v26 = vadd.f32 1.0, %v2045_v23  ;;  %v1122_v27 = vpop.f32.mrf.mxu1  ;;  %v1005_v28 = vmul.f32 -0.5, %v2045_v23  ;;  %v1008_v35 = vand.u32 2147483647, %v2045_v23 }
 0x176   : > { %1300 = vst [vmem:[%s2701_s16 + $0x30] sm:$0xff] %v1296_v25  ;;  %v1301_v29 = vsub.f32 0.0, %v1296_v25 }
 0x177   : > { %2046 = vlog2.f32 %v1002_v26  ;;  %v1006_v34 = vadd.f32 1.0, %v1005_v28  ;;  %v1282_v36 = vpop.f32.mrf.mxu2  ;;  %vm1009_vm2 = vcmp.lt.f32.partialorder %v1008_v35, 0.0004427343 }
 0x178   : > { %v1297_v30 = vpop.f32.mrf.mxu3  ;;  %v1302_v32 = vmul.f32 1.442695, %v1301_v29  ;;  %v1283_v37 = vadd.f32 %v1282_v36, %v1173_v31 }
 0x179   : > { %v1187_v33 = vpop.f32.mrf.mxu0  ;;  %v1007_v40 = vmul.f32 %v2045_v23, %v1006_v34 }
 0x17a   : > { %2048 = vpow2.f32 %v1302_v32  ;;  %1299 = vst [vmem:[%s2713_s25 + $0x10] sm:$0xff] %v1283_v37 }
 0x17d   : > { %v2047_v38 = vpop.eup %2046 }
 0x17e   : > { %v1004_v39 = vmul.f32 0.6931472, %v2047_v38 }
 0x17f   : > { %v1284_v47 = vpop.f32.mrf.mxu2 }
 0x180   : > { %v2049_v41 = vpop.eup %2048  ;;  %v1010_v42 = vsel %vm1009_vm2, %v1007_v40, %v1004_v39 }
 0x181   : > { %v1011_v43 = vsel %vm998_vm3, %v995_v7, %v1010_v42  ;;  %v1304_v45 = vadd.f32 1.0, %v2049_v41 }
 0x182   : > { %v1012_v46 = vadd.f32 1e-08, %v1011_v43 }
 0x183   : > { %2050 = vrcp.f32 %v1304_v45  ;;  %v1316_v53 = vand.u32 2147483648, %v1304_v45  ;;  %vm1310_vm4 = vweird.f32 %v1304_v45  ;;  %v1314_v55 = vand.u32 2147483647, %v1304_v45 }
 0x184   : > { %v1014_v48 = vmul.f32 %v1013_v44, %v1012_v46  ;;  %1019 = vst [vmem:[%s2701_s16 + $0x8] sm:$0xff] %v1012_v46 }
 0x185   : > { %v1317_v57 = vor.u32 1.1754944e-38, %v1316_v53  ;;  %vm1315_vm7 = vcmp.eq.f32.partialorder %v1314_v55, 8.507059e+37 }
 0x186   : > { %v1015_v49 = vadd.f32 %v1014_v48, %v982_v2 }
 0x188   : > { %1020 = vst [vmem:[%s2701_s16 + $0x10] sm:$0xff] %v1015_v49  ;;  %v1016_v50 = vmul.f32 1.442695, %v1015_v49 }
 0x189   : > { %v2051_v51 = vpop.eup %2050 }
 0x18a   : > { %2052 = vpow2.f32 %v1016_v50  ;;  %v1306_v52 = vmul.f32 %v2051_v51, %v1304_v45  ;;  %vm1311_vm5 = vweird.f32 %v2051_v51 }
 0x18b   : > { %vm1312_vm6 = vmor %vm1310_vm4, %vm1311_vm5 }
 0x18c   : > { %v1307_v54 = vsub.f32 1.0, %v1306_v52 }
 0x18e   : > { %v1308_v56 = vmul.f32 %v2051_v51, %v1307_v54 }
 0x190   : > { %v2053_v8 = vpop.eup %2052  ;;  %v1309_v59 = vadd.f32 %v2051_v51, %v1308_v56 }
 0x191   : > { %1021 = vst [vmem:[%s2701_s16 + $0x18] sm:$0xff] %v2053_v8  ;;  %v1126_v60 = vmul.f32 %v2053_v8, %v1125_v22 }
 0x192   : > { %v1313_v61 = vsel %vm1312_vm6, %v2051_v51, %v1309_v59 }
 0x193   : > { %1128 = vst [vmem:[%s2701_s16 + $0x28] sm:$0xff] %v1126_v60  ;;  %v1318_v62 = vsel %vm1315_vm7, %v1317_v57, %v1313_v61 }
 0x194   : > { %v1320_v63 = vsub.f32 1.0, %v1318_v62 }
 0x196   : > { %v1321_v1 = vmul.f32 %v1320_v63, %v1126_v60 }
 0x198   : > { %v1325_v2 = vsel %vm1322_vm8, %v1321_v1, 0.0 }
 0x199   : > { %1326 = vadd.xlane.f32.xlu1 %v1325_v2 }
 0x1b2   : > { %823 = vperm.xlu1 %2040, %v820_v3  }
 0x1d4   : > { %v798_v5 = vpop.xlane.xlu0 %797 }
 0x1d5   : > { %v799_v6 = vsub.f32 %v2698_v0, %v798_v5 }
 0x1d7   : > { %v800_v7 = vmul.f32 1.442695, %v799_v6 }
 0x1d9   : > { %2054 = vpow2.f32 %v800_v7 }
 0x1df   : > { %v2055_v58 = vpop.eup %2054 }
 0x1e0   : > { %802 = vadd.xlane.f32.xlu0 %v2055_v58 }
 0x20c   : > { %v1327_v9 = vpop.xlane.xlu1 %1326 }
 0x20d   : > { %v1328_v10 = vmax.f32 %v1327_v9, 1e-12 }
 0x20f   : > { %2056 = vrcp.f32 %v1328_v10  ;;  %v1340_v14 = vand.u32 2147483648, %v1328_v10  ;;  %v1338_v16 = vand.u32 2147483647, %v1328_v10  ;;  %vm1334_vm10 = vweird.f32 %v1328_v10 }
 0x211   : > { %v1341_v17 = vor.u32 1.1754944e-38, %v1340_v14  ;;  %vm1339_vm12 = vcmp.eq.f32.partialorder %v1338_v16, 8.507059e+37 }
 0x215   : > { %v2057_v11 = vpop.eup %2056 }
 0x216   : > { %v1330_v12 = vmul.f32 %v2057_v11, %v1328_v10  ;;  %vm1335_vm9 = vweird.f32 %v2057_v11 }
 0x217   : > { %vm1336_vm11 = vmor %vm1334_vm10, %vm1335_vm9 }
 0x218   : > { %v1331_v13 = vsub.f32 1.0, %v1330_v12 }
 0x21a   : > { %v1332_v15 = vmul.f32 %v2057_v11, %v1331_v13 }
 0x21c   : > { %v1333_v0 = vadd.f32 %v2057_v11, %v1332_v15 }
 0x21e   : > { %v1337_v18 = vsel %vm1336_vm11, %v2057_v11, %v1333_v0 }
 0x21f   : > { %v1342_v19 = vsel %vm1339_vm12, %v1341_v17, %v1337_v18 }
 0x220   : > { %v1343_v20 = vmul.f32 %v1342_v19, %v1325_v2 }
 0x222   : > { %1344 = vst [vmem:[%s2701_s16 + $0x38] sm:$0xff] %v1343_v20 }
 0x223   : > { %2327 = shalt.err (!%p2324_p10)
}
 0x224   : > { %1940 = dma.vmem_to_hbm [thread:$0]  (%p2599_p13), %s1380_s20, 1024, %s1382_s5, %s1351_s1   ;;  %v824_v31 = vpop.permute.xlu1 %823 }
 0x225   : > { %s1908_s16 = smul.u32 24, %s2521_s28  ;;  %s2814_s18 = sld [smem:[#allocation30_spill]] }
 0x226   : > { %s1364_s28 = sshll.u32 %s2713_s25, 4  ;;  %s1346_s1 = scalar_lea.sflag [#allocation4], %s2630_s27  ;;  %s1365_s28 = int_to_ptr.vmem [resolvable:$true] %s1364_s28 }
 0x22b   : > { %s1362_s20 = scalar_lea.hbm %s2814_s18, %s1908_s16  ;;  %s2348_s16 = scalar_lea.hbm %s2814_s18, 48 }
 0x22c   : > { %s1366_s5 = sshll.u32 %s1362_s20, 4  ;;  %s1367_s5 = int_to_ptr.hbm [resolvable:$true] %s1366_s5 }
 0x22d   : > { %s2342_s29 = sshra.s32 %s1367_s5, 4  ;;  %s2343_s29 = int_to_ptr.hbm [resolvable:$true] %s2342_s29 }
 0x22e   : > { %s2344_s17 = scalar_lea.hbm %s2343_s29, 24  ;;  %p2349_p6 = scmp.lt.s32.totalorder %s2343_s29, %s2814_s18 }
 0x22f   : > { %p2345_p11 = scmp.ne.s32.totalorder %s2343_s29, %s2344_s17  ;;  %p2350_p3 = scmp.lt.s32.totalorder %s2348_s16, %s2344_s17 }
 0x231   : > { %p2346_p0 = pnand %p2345_p11, %p2599_p13  ;;  %p2351_p1 = por %p2350_p3, %p2349_p6 }
 0x233   : > { %p2347_p2 = pneg %p2346_p0 }
 0x235   : > { %p2352_p5 = pnand %p2351_p1, %p2347_p2 }
 0x253   : > { %v803_v21 = vpop.xlane.xlu0 %802 }
 0x254   : > { %2058 = vrcp.f32 %v803_v21  ;;  %v815_v25 = vand.u32 2147483648, %v803_v21  ;;  %v813_v27 = vand.u32 2147483647, %v803_v21  ;;  %vm809_vm14 = vweird.f32 %v803_v21 }
 0x256   : > { %v816_v29 = vor.u32 1.1754944e-38, %v815_v25  ;;  %vm814_vm0 = vcmp.eq.f32.partialorder %v813_v27, 8.507059e+37 }
 0x25a   : > { %v2059_v22 = vpop.eup %2058 }
 0x25b   : > { %v805_v23 = vmul.f32 %v2059_v22, %v803_v21  ;;  %vm810_vm13 = vweird.f32 %v2059_v22 }
 0x25c   : > { %vm811_vm15 = vmor %vm809_vm14, %vm810_vm13 }
 0x25d   : > { %v806_v24 = vsub.f32 1.0, %v805_v23 }
 0x25f   : > { %v807_v26 = vmul.f32 %v2059_v22, %v806_v24 }
 0x261   : > { %v808_v28 = vadd.f32 %v2059_v22, %v807_v26 }
 0x263   : > { %v812_v30 = vsel %vm811_vm15, %v2059_v22, %v808_v28 }
 0x264   : > { %v817_v32 = vsel %vm814_vm0, %v816_v29, %v812_v30 }
 0x265   : > { %v818_v33 = vmul.f32 %v2055_v58, %v817_v32 }
 0x267   : > { %819 = vst [vmem:[%s2713_s25] sm:$0xff] %v818_v33  ;;  %v826_v34 = vmul.f32 %v824_v31, %v818_v33 }
 0x269   : > { %827 = vst [vmem:[%s2713_s25 + $0x8] sm:$0xff] %v826_v34 }
 0x26a   : > { %2355 = shalt.err (!%p2352_p5)
}
 0x26b   : > { %1939 = dma.vmem_to_hbm [thread:$0]  (%p2599_p13), %s1365_s28, 384, %s1367_s5, %s1346_s1  }
 0x26c PF: > { %s1393_s27 = sand.u32 1, %s2402_s21   ;;  %p2815_p12 = scmp.ge.s32.totalorder %s2414_s24, 2 }
 0x26d   : > { %s1394_s25 = scalar_lea.sflag [#allocation4], %s1393_s27 }
 0x26e   : > { %p1970_p8 = pnand %p2815_p12, %p2604_p4 }
 0x270   : > { %p1971_p7 = pneg %p1970_p8 }
 0x272   : > { %2393 = dma.done.wait (%p1971_p7), %s1394_s25, 384  }
 0x273   : > { %2395 = vsyncadd (%p1971_p7), %s1394_s25, 4294966912  ;;  %s1404_s20 = scalar_lea.sflag [#allocation18], %s1393_s27 }
 0x274   : > { %2397 = dma.done.wait (%p1971_p7), %s1404_s20, 1024  }
 0x275   : > { %2399 = vsyncadd (%p1971_p7), %s1404_s20, 4294966272  ;;  %p33_p13 = scmp.ge.s32.totalorder %s2579_s12, 4   ;;  %s2816_s21 = smov %s2406_s22 }
 0x276   : > { %s2817_s22 = smov %s2410_s23  ;;  %s2818_s23 = smov %s2591_s30 }
 0x277   : > { %s2819_s24 = smov %s2579_s12  ;;  %35 = sbr.rel (!%p33_p13) target bundleno = 18 (0x12), region = 160 }
 0x27c   :  { %1410 = vsyncpa [#allocation3], 1 }
 0x27d   :  { %1412 = vsyncpa [#allocation3 + $0x1], 1 }
 0x27e   :  { %1413 = vsyncpa [#allocation6], 1 }
 0x27f   :  { %1414 = vsyncpa [#allocation9], 1 }
 0x280   :  { %1415 = vsyncpa [#allocation12], 1 }
 0x281   :  { %1416 = vsyncpa [#allocation15], 1 }
 0x282   :  { %1417 = vsyncpa [#allocation4], 1 }
 0x283   :  { %1419 = vsyncpa [#allocation4 + $0x1], 1 }
 0x284   :  { %1420 = vsyncpa [#allocation18], 1 }
 0x285   :  { %1422 = vsyncpa [#allocation18 + $0x1], 1 }

</bundles_post_ra>
